<compile_context>
chip_gen: v5e
topology: v5e:2x2
jax: 0.10.0
libtpu: 0.0.40
codegen_flags: <defaults>
</compile_context>

<pallas_src>
import functools

import jax
import jax.numpy as jnp
from jax.experimental import pallas as pl
from jax.experimental.pallas import tpu as pltpu


LANE = 128  # TPU lane width; all channel dims are padded to a multiple of this.


# ----------------------------- Pallas kernels --------------------------------
def transform_kernel(x_ref, w_ref, z_ref):
    """Row-tile dense transform: Z_tile = X_tile @ W (stored in bf16)."""
    z_ref[...] = jnp.dot(
        x_ref[...], w_ref[...], preferred_element_type=jnp.float32
    ).astype(z_ref.dtype)


def agg_transform_kernel(a_ref, z_ref, b_ref, al_ref, w_ref, out_ref, acc_ref):
    """Z_next_tile = PReLU(sum_k A_hat[i,k] @ Z[k] + b) @ W_next (bf16 out)."""
    k = pl.program_id(1)

    @pl.when(k == 0)
    def _():
        acc_ref[...] = jnp.zeros_like(acc_ref)

    acc_ref[...] += jnp.dot(
        a_ref[...], z_ref[...], preferred_element_type=jnp.float32
    )

    @pl.when(k == pl.num_programs(1) - 1)
    def _():
        h = acc_ref[...] + b_ref[...]
        h = jnp.where(h >= 0.0, h, al_ref[...] * h)                 # PReLU
        out_ref[...] = jnp.dot(
            h, w_ref[...], preferred_element_type=jnp.float32
        ).astype(out_ref.dtype)


def agg_classifier_kernel(
    a_ref, z_ref, b_ref, al_ref, wc1_ref, bc1_ref, wc2_ref, bc2_ref,
    out_ref, acc_ref,
):
    """logits_tile = Lin2(ReLU(Lin1(PReLU(sum_k A_hat[i,k] @ Z[k] + b))))."""
    k = pl.program_id(1)

    @pl.when(k == 0)
    def _():
        acc_ref[...] = jnp.zeros_like(acc_ref)

    acc_ref[...] += jnp.dot(
        a_ref[...], z_ref[...], preferred_element_type=jnp.float32
    )

    @pl.when(k == pl.num_programs(1) - 1)
    def _():
        h = acc_ref[...] + b_ref[...]
        h = jnp.where(h >= 0.0, h, al_ref[...] * h)                 # PReLU
        h = jnp.dot(h, wc1_ref[...], preferred_element_type=jnp.float32) + bc1_ref[...]
        h = jnp.maximum(h, 0.0)                                     # ReLU
        out_ref[...] = (
            jnp.dot(h, wc2_ref[...], preferred_element_type=jnp.float32)
            + bc2_ref[...]
        ).astype(out_ref.dtype)


# ------------------------------- wrapper --------------------------------------
def _round_up(x, m):
    return ((x + m - 1) // m) * m


def _pad2d(a, rows, cols):
    r, c = a.shape
    return jnp.pad(a, ((0, rows - r), (0, cols - c)))


@functools.partial(jax.jit, static_argnums=(3, 4, 5))
def gcn_node_classif(a_hat, x, params, nclasses, tile_n=128, tile_k=128):
    """Fused forward via three pallas_calls.

    tile_n: dst-node tile size (output rows per grid step).
    tile_k: src-node reduction tile size for the aggregation matmuls.
    Both 128-aligned tiles work on every generation (v5e MXU is 4x128^2).
    """
    n, in_ch = x.shape
    hid = params["w0"].shape[1]

    n_pad = _round_up(n, max(tile_n, tile_k))
    in_pad = _round_up(in_ch, LANE)
    hid_pad = _round_up(hid, LANE)
    cls_pad = _round_up(nclasses, LANE)

    # Zero padding keeps the math exact for the real rows/channels; padded
    # rows/columns are sliced off at the end.
    a_p = _pad2d(a_hat, n_pad, n_pad).astype(jnp.bfloat16)     # dominant operand -> bf16
    x_p = _pad2d(x, n_pad, in_pad)
    w0 = _pad2d(params["w0"], in_pad, hid_pad)
    b0 = _pad2d(params["b0"], 1, hid_pad)
    al0 = _pad2d(params["al0"], 1, hid_pad)
    w1 = _pad2d(params["w1"], hid_pad, hid_pad)
    b1 = _pad2d(params["b1"], 1, hid_pad)
    al1 = _pad2d(params["al1"], 1, hid_pad)
    wc1 = _pad2d(params["wc1"], hid_pad, hid_pad)
    bc1 = _pad2d(params["bc1"], 1, hid_pad)
    wc2 = _pad2d(params["wc2"], hid_pad, cls_pad)
    bc2 = _pad2d(params["bc2"], 1, cls_pad)

    n_tiles = n_pad // tile_n
    k_tiles = n_pad // tile_k

    cparams_1d = pltpu.CompilerParams(
        dimension_semantics=("parallel",),
        vmem_limit_bytes=32 * 1024 * 1024,        # safe on 64 MiB v7x
    )
    cparams_2d = pltpu.CompilerParams(
        dimension_semantics=("parallel", "arbitrary"),
        vmem_limit_bytes=32 * 1024 * 1024,
    )

    def full_spec_1d(rows, cols):
        return pl.BlockSpec((rows, cols), lambda i: (0, 0))

    def full_spec_2d(rows, cols):
        return pl.BlockSpec((rows, cols), lambda i, k: (0, 0))

    # ---- call A: Z0 = X_pad @ W0  (row-tiled dense transform) --------------
    z0 = pl.pallas_call(
        transform_kernel,
        out_shape=jax.ShapeDtypeStruct((n_pad, hid_pad), jnp.bfloat16),
        grid=(n_tiles,),
        in_specs=[
            pl.BlockSpec((tile_n, in_pad), lambda i: (i, 0)),
            full_spec_1d(in_pad, hid_pad),
        ],
        out_specs=pl.BlockSpec((tile_n, hid_pad), lambda i: (i, 0)),
        compiler_params=cparams_1d,
        cost_estimate=pl.CostEstimate(
            flops=2 * n_pad * in_pad * hid_pad,
            transcendentals=0,
            bytes_accessed=4 * (n_pad * in_pad + in_pad * hid_pad)
            + 2 * n_pad * hid_pad,
        ),
    )(x_p, w0)

    # ---- call B: Z1 = PReLU(A_hat @ Z0 + b0) @ W1  (K-tiled aggregation) ----
    z1 = pl.pallas_call(
        agg_transform_kernel,
        out_shape=jax.ShapeDtypeStruct((n_pad, hid_pad), jnp.bfloat16),
        grid=(n_tiles, k_tiles),
        in_specs=[
            pl.BlockSpec((tile_n, tile_k), lambda i, k: (i, k)),   # A_hat block
            pl.BlockSpec((tile_k, hid_pad), lambda i, k: (k, 0)),  # Z0 src tile
            full_spec_2d(1, hid_pad),                              # b0
            full_spec_2d(1, hid_pad),                              # PReLU alpha0
            full_spec_2d(hid_pad, hid_pad),                        # W1
        ],
        out_specs=pl.BlockSpec((tile_n, hid_pad), lambda i, k: (i, 0)),
        scratch_shapes=[pltpu.VMEM((tile_n, hid_pad), jnp.float32)],
        compiler_params=cparams_2d,
        cost_estimate=pl.CostEstimate(
            flops=2 * n_pad * n_pad * hid_pad + 2 * n_pad * hid_pad * hid_pad,
            transcendentals=0,
            bytes_accessed=2 * n_pad * n_pad
            + 2 * n_pad * hid_pad * (n_pad // tile_n)   # Z0 re-streamed per dst tile
            + 4 * hid_pad * hid_pad
            + 2 * n_pad * hid_pad,
        ),
    )(a_p, z0, b0, al0, w1)

    # ---- call C: logits = classifier(PReLU(A_hat @ Z1 + b1)) ----------------
    logits_pad = pl.pallas_call(
        agg_classifier_kernel,
        out_shape=jax.ShapeDtypeStruct((n_pad, cls_pad), jnp.float32),
        grid=(n_tiles, k_tiles),
        in_specs=[
            pl.BlockSpec((tile_n, tile_k), lambda i, k: (i, k)),   # A_hat block
            pl.BlockSpec((tile_k, hid_pad), lambda i, k: (k, 0)),  # Z1 src tile
            full_spec_2d(1, hid_pad),                              # b1
            full_spec_2d(1, hid_pad),                              # PReLU alpha1
            full_spec_2d(hid_pad, hid_pad),                        # Wc1
            full_spec_2d(1, hid_pad),                              # bc1
            full_spec_2d(hid_pad, cls_pad),                        # Wc2
            full_spec_2d(1, cls_pad),                              # bc2
        ],
        out_specs=pl.BlockSpec((tile_n, cls_pad), lambda i, k: (i, 0)),
        scratch_shapes=[pltpu.VMEM((tile_n, hid_pad), jnp.float32)],
        compiler_params=cparams_2d,
        cost_estimate=pl.CostEstimate(
            flops=2 * n_pad * n_pad * hid_pad
            + 2 * n_pad * hid_pad * hid_pad
            + 2 * n_pad * hid_pad * cls_pad,
            transcendentals=0,
            bytes_accessed=2 * n_pad * n_pad
            + 2 * n_pad * hid_pad * (n_pad // tile_n)
            + 4 * (hid_pad * hid_pad + hid_pad * cls_pad)
            + 4 * n_pad * cls_pad,
        ),
    )(a_p, z1, b1, al1, wc1, bc1, wc2, bc2)

    # Slice padded rows / lanes back to the logical shape.
    return logits_pad[:n, :nclasses]


# ------------------------------ glue (plain JAX) -------------------------------
def build_normalized_adjacency(edge_index, edge_weight, num_nodes):
    """Dense A_hat = D^{-1/2} (A + I) D^{-1/2}, A[dst, src] = edge_weight."""
    src = edge_index[0]
    dst = edge_index[1]
    a = jnp.zeros((num_nodes, num_nodes), jnp.float32)
    a = a.at[dst, src].add(edge_weight)
    a = a.at[jnp.arange(num_nodes), jnp.arange(num_nodes)].add(1.0)  # self loops
    deg = a.sum(axis=1)
    dis = jnp.where(deg > 0, jax.lax.rsqrt(deg), 0.0)
    return dis[:, None] * a * dis[None, :]


def init_params(key, in_channels, hidden, nclasses):
    """Deterministic synthetic parameter init (matches the module's shapes)."""
    ks = jax.random.split(key, 6)

    def glorot(k, fan_in, fan_out):
        limit = jnp.sqrt(6.0 / (fan_in + fan_out))
        # stored pre-transposed as (in, out) so the kernels do X @ W
        return jax.random.uniform(k, (fan_in, fan_out), jnp.float32, -limit, limit)

    return {
        # GCNConv 0: lin(in->hidden, bias) + PReLU(hidden, alpha=0.25)
        "w0": glorot(ks[0], in_channels, hidden),
        "b0": jnp.zeros((1, hidden), jnp.float32),
        "al0": jnp.full((1, hidden), 0.25, jnp.float32),
        # GCNConv 1: lin(hidden->hidden)
        "w1": glorot(ks[1], hidden, hidden),
        "b1": jnp.zeros((1, hidden), jnp.float32),
        "al1": jnp.full((1, hidden), 0.25, jnp.float32),
        # classifier Linear(hidden, hidden) + Linear(hidden, nclasses)
        "wc1": glorot(ks[2], hidden, hidden),
        "bc1": jax.random.uniform(ks[3], (1, hidden), jnp.float32, -0.1, 0.1),
        "wc2": glorot(ks[4], hidden, nclasses),
        "bc2": jax.random.uniform(ks[5], (1, nclasses), jnp.float32, -0.1, 0.1),
    }


def reference_forward(a_hat, x, p):
    """Pure-JAX reference mirroring the kernels' bf16/f32 precision choices."""
    bf = jnp.bfloat16
    a = a_hat.astype(bf)
    z = (x @ p["w0"]).astype(bf)                                          # call A
    h = jnp.dot(a, z, preferred_element_type=jnp.float32) + p["b0"]       # call B
    h = jnp.where(h >= 0.0, h, p["al0"] * h)
    z = (h @ p["w1"]).astype(bf)
    h = jnp.dot(a, z, preferred_element_type=jnp.float32) + p["b1"]       # call C
    h = jnp.where(h >= 0.0, h, p["al1"] * h)
    h = jnp.maximum(h @ p["wc1"] + p["bc1"], 0.0)
    return h @ p["wc2"] + p["bc2"]


if __name__ == "__main__":
    # Small, module-consistent shapes: N nodes, in_channels, hidden, n_layers=2,
    # nclasses.  N=256 with 128-tiles exercises both grid axes (2 x 2).
    N, IN_CH, HIDDEN, NCLASSES = 256, 16, 32, 8
    NUM_EDGES = 1024
    TILE_N, TILE_K = 128, 128

    key = jax.random.PRNGKey(0)
    k_x, k_src, k_dst, k_ew, k_par = jax.random.split(key, 5)

    # data.x, data.edge_index, data.edge_weight
    x = jax.random.normal(k_x, (N, IN_CH), jnp.float32)
    src = jax.random.randint(k_src, (NUM_EDGES,), 0, N)
    dst = jax.random.randint(k_dst, (NUM_EDGES,), 0, N)
    edge_index = jnp.stack([src, dst], axis=0)
    edge_weight = jax.random.uniform(k_ew, (NUM_EDGES,), jnp.float32, 0.1, 1.0)

    # NOTE: F.dropout is identity in eval mode; reproduced as identity here.
    a_hat = build_normalized_adjacency(edge_index, edge_weight, N)
    params = init_params(k_par, IN_CH, HIDDEN, NCLASSES)

    out = gcn_node_classif(a_hat, x, params, NCLASSES, TILE_N, TILE_K)
    out = jax.block_until_ready(out)

    ref = reference_forward(a_hat, x, params)
    assert out.shape == (N, NCLASSES)
    # bf16 adjacency/activations with f32 accumulation -> ~1e-3..1e-2 abs error.
    assert jnp.allclose(out, ref, atol=5e-2, rtol=5e-2), float(
        jnp.max(jnp.abs(out - ref))
    )

    print("KERNEL_OK")
</pallas_src>

<mosaic_0001>
module attributes {stable_mosaic.version = 11 : i64} {
  func.func @transform_kernel(%arg0: i32, %arg1: memref<128x128xf32, #tpu.memory_space<vmem>>, %arg2: memref<128x128xf32, #tpu.memory_space<vmem>>, %arg3: memref<128x128xbf16, #tpu.memory_space<vmem>>) attributes {dimension_semantics = [#tpu.dimension_semantics<parallel>], iteration_bounds = array<i64: 2>, scalar_prefetch = 0 : i64, scratch_operands = 0 : i64, tpu.core_type = #tpu.core_type<tc>, window_params = [{transform_indices = @transform_0, window_bounds = array<i64: 128, 128>}, {pipeline_mode = #tpu.pipeline_mode<synchronous>, transform_indices = @transform_1, window_bounds = array<i64: 128, 128>}, {transform_indices = @transform_2, window_bounds = array<i64: 128, 128>}]} {
    %c0 = arith.constant 0 : index
    %c0_0 = arith.constant 0 : index
    %0 = vector.load %arg1[%c0, %c0_0] : memref<128x128xf32, #tpu.memory_space<vmem>>, vector<128x128xf32>
    %c0_1 = arith.constant 0 : index
    %c0_2 = arith.constant 0 : index
    %1 = vector.load %arg2[%c0_1, %c0_2] : memref<128x128xf32, #tpu.memory_space<vmem>>, vector<128x128xf32>
    %cst = arith.constant dense<0.000000e+00> : vector<128x128xf32>
    %2 = tpu.matmul %0, %1, %cst {dimension_numbers = #tpu.dot_dimension_numbers<[1], [0], [0], [1], [0, 0, 1, 1], [], []>} : vector<128x128xf32>, vector<128x128xf32>, vector<128x128xf32> -> vector<128x128xf32>
    %3 = arith.truncf %2 : vector<128x128xf32> to vector<128x128xbf16>
    %c0_3 = arith.constant 0 : index
    %c0_4 = arith.constant 0 : index
    %4 = vector.load %arg3[%c0_3, %c0_4] : memref<128x128xbf16, #tpu.memory_space<vmem>>, vector<128x128xbf16>
    tpu.vector_store %arg3[%c0_3, %c0_4], %3 {strides = array<i32>} : memref<128x128xbf16, #tpu.memory_space<vmem>>, vector<128x128xbf16>,
    return
  }
  func.func @transform_0(%arg0: i32) -> (i32, i32) {
    %c0_i32 = arith.constant 0 : i32
    %c0_i32_0 = arith.constant 0 : i32
    return %arg0, %c0_i32 : i32, i32
  }
  func.func @transform_1(%arg0: i32) -> (i32, i32) {
    %c0_i32 = arith.constant 0 : i32
    %c0_i32_0 = arith.constant 0 : i32
    %c0_i32_1 = arith.constant 0 : i32
    return %c0_i32, %c0_i32_0 : i32, i32
  }
  func.func @transform_2(%arg0: i32) -> (i32, i32) {
    %c0_i32 = arith.constant 0 : i32
    %c0_i32_0 = arith.constant 0 : i32
    return %arg0, %c0_i32 : i32, i32
  }
}

module attributes {stable_mosaic.version = 11 : i64} {
  func.func @agg_transform_kernel(%arg0: i32, %arg1: i32, %arg2: memref<128x128xbf16, #tpu.memory_space<vmem>>, %arg3: memref<128x128xbf16, #tpu.memory_space<vmem>>, %arg4: memref<1x128xf32, #tpu.memory_space<vmem>>, %arg5: memref<1x128xf32, #tpu.memory_space<vmem>>, %arg6: memref<128x128xf32, #tpu.memory_space<vmem>>, %arg7: memref<128x128xbf16, #tpu.memory_space<vmem>>, %arg8: memref<128x128xf32, #tpu.memory_space<vmem>>) attributes {dimension_semantics = [#tpu.dimension_semantics<parallel>, #tpu.dimension_semantics<arbitrary>], iteration_bounds = array<i64: 2, 2>, scalar_prefetch = 0 : i64, scratch_operands = 1 : i64, tpu.core_type = #tpu.core_type<tc>, window_params = [{transform_indices = @transform_0, window_bounds = array<i64: 128, 128>}, {transform_indices = @transform_1, window_bounds = array<i64: 128, 128>}, {pipeline_mode = #tpu.pipeline_mode<synchronous>, transform_indices = @transform_2, window_bounds = array<i64: 1, 128>}, {pipeline_mode = #tpu.pipeline_mode<synchronous>, transform_indices = @transform_3, window_bounds = array<i64: 1, 128>}, {pipeline_mode = #tpu.pipeline_mode<synchronous>, transform_indices = @transform_4, window_bounds = array<i64: 128, 128>}, {transform_indices = @transform_5, window_bounds = array<i64: 128, 128>}]} {
    %c0_i32 = arith.constant 0 : i32
    %0 = arith.cmpi eq, %arg1, %c0_i32 : i32
    %1 = arith.extui %0 : i1 to i32
    %c0_i32_0 = arith.constant 0 : i32
    %2 = arith.cmpi ne, %1, %c0_i32_0 : i32
    scf.if %2 {
      %cst_9 = arith.constant 0.000000e+00 : f32
      %12 = vector.broadcast %cst_9 : f32 to vector<128x128xf32>
      %c0_10 = arith.constant 0 : index
      %c0_11 = arith.constant 0 : index
      %13 = vector.load %arg8[%c0_10, %c0_11] : memref<128x128xf32, #tpu.memory_space<vmem>>, vector<128x128xf32>
      tpu.vector_store %arg8[%c0_10, %c0_11], %12 {strides = array<i32>} : memref<128x128xf32, #tpu.memory_space<vmem>>, vector<128x128xf32>,
    } else {
    }
    %c0 = arith.constant 0 : index
    %c0_1 = arith.constant 0 : index
    %3 = vector.load %arg8[%c0, %c0_1] : memref<128x128xf32, #tpu.memory_space<vmem>>, vector<128x128xf32>
    %c0_2 = arith.constant 0 : index
    %c0_3 = arith.constant 0 : index
    %4 = vector.load %arg2[%c0_2, %c0_3] : memref<128x128xbf16, #tpu.memory_space<vmem>>, vector<128x128xbf16>
    %c0_4 = arith.constant 0 : index
    %c0_5 = arith.constant 0 : index
    %5 = vector.load %arg3[%c0_4, %c0_5] : memref<128x128xbf16, #tpu.memory_space<vmem>>, vector<128x128xbf16>
    %cst = arith.constant dense<0.000000e+00> : vector<128x128xf32>
    %6 = tpu.matmul %4, %5, %cst {dimension_numbers = #tpu.dot_dimension_numbers<[1], [0], [0], [1], [0, 0, 1, 1], [], []>} : vector<128x128xbf16>, vector<128x128xbf16>, vector<128x128xf32> -> vector<128x128xf32>
    %7 = arith.addf %3, %6 : vector<128x128xf32>
    %c0_6 = arith.constant 0 : index
    %c0_7 = arith.constant 0 : index
    %8 = vector.load %arg8[%c0_6, %c0_7] : memref<128x128xf32, #tpu.memory_space<vmem>>, vector<128x128xf32>
    tpu.vector_store %arg8[%c0_6, %c0_7], %7 {strides = array<i32>} : memref<128x128xf32, #tpu.memory_space<vmem>>, vector<128x128xf32>,
    %c1_i32 = arith.constant 1 : i32
    %9 = arith.cmpi eq, %arg1, %c1_i32 : i32
    %10 = arith.extui %9 : i1 to i32
    %c0_i32_8 = arith.constant 0 : i32
    %11 = arith.cmpi ne, %10, %c0_i32_8 : i32
    scf.if %11 {
      %c0_9 = arith.constant 0 : index
      %c0_10 = arith.constant 0 : index
      %12 = vector.load %arg8[%c0_9, %c0_10] : memref<128x128xf32, #tpu.memory_space<vmem>>, vector<128x128xf32>
      %c0_11 = arith.constant 0 : index
      %c0_12 = arith.constant 0 : index
      %13 = vector.load %arg4[%c0_11, %c0_12] : memref<1x128xf32, #tpu.memory_space<vmem>>, vector<1x128xf32>
      %14 = vector.broadcast %13 : vector<1x128xf32> to vector<128x128xf32>
      %15 = arith.addf %12, %14 : vector<128x128xf32>
      %cst_13 = arith.constant 0.000000e+00 : f32
      %16 = vector.broadcast %cst_13 : f32 to vector<128x128xf32>
      %17 = arith.cmpf oge, %15, %16 : vector<128x128xf32>
      %c0_14 = arith.constant 0 : index
      %c0_15 = arith.constant 0 : index
      %18 = vector.load %arg5[%c0_14, %c0_15] : memref<1x128xf32, #tpu.memory_space<vmem>>, vector<1x128xf32>
      %19 = vector.broadcast %18 : vector<1x128xf32> to vector<128x128xf32>
      %20 = arith.mulf %19, %15 : vector<128x128xf32>
      %21 = arith.select %17, %15, %20 : vector<128x128xi1>, vector<128x128xf32>
      %c0_16 = arith.constant 0 : index
      %c0_17 = arith.constant 0 : index
      %22 = vector.load %arg6[%c0_16, %c0_17] : memref<128x128xf32, #tpu.memory_space<vmem>>, vector<128x128xf32>
      %cst_18 = arith.constant dense<0.000000e+00> : vector<128x128xf32>
      %23 = tpu.matmul %21, %22, %cst_18 {dimension_numbers = #tpu.dot_dimension_numbers<[1], [0], [0], [1], [0, 0, 1, 1], [], []>} : vector<128x128xf32>, vector<128x128xf32>, vector<128x128xf32> -> vector<128x128xf32>
      %24 = arith.truncf %23 : vector<128x128xf32> to vector<128x128xbf16>
      %c0_19 = arith.constant 0 : index
      %c0_20 = arith.constant 0 : index
      %25 = vector.load %arg7[%c0_19, %c0_20] : memref<128x128xbf16, #tpu.memory_space<vmem>>, vector<128x128xbf16>
      tpu.vector_store %arg7[%c0_19, %c0_20], %24 {strides = array<i32>} : memref<128x128xbf16, #tpu.memory_space<vmem>>, vector<128x128xbf16>,
    } else {
    }
    return
  }
  func.func @transform_0(%arg0: i32, %arg1: i32) -> (i32, i32) {
    %c0_i32 = arith.constant 0 : i32
    return %arg0, %arg1 : i32, i32
  }
  func.func @transform_1(%arg0: i32, %arg1: i32) -> (i32, i32) {
    %c0_i32 = arith.constant 0 : i32
    %c0_i32_0 = arith.constant 0 : i32
    return %arg1, %c0_i32 : i32, i32
  }
  func.func @transform_2(%arg0: i32, %arg1: i32) -> (i32, i32) {
    %c0_i32 = arith.constant 0 : i32
    %c0_i32_0 = arith.constant 0 : i32
    %c0_i32_1 = arith.constant 0 : i32
    return %c0_i32, %c0_i32_0 : i32, i32
  }
  func.func @transform_3(%arg0: i32, %arg1: i32) -> (i32, i32) {
    %c0_i32 = arith.constant 0 : i32
    %c0_i32_0 = arith.constant 0 : i32
    %c0_i32_1 = arith.constant 0 : i32
    return %c0_i32, %c0_i32_0 : i32, i32
  }
  func.func @transform_4(%arg0: i32, %arg1: i32) -> (i32, i32) {
    %c0_i32 = arith.constant 0 : i32
    %c0_i32_0 = arith.constant 0 : i32
    %c0_i32_1 = arith.constant 0 : i32
    return %c0_i32, %c0_i32_0 : i32, i32
  }
  func.func @transform_5(%arg0: i32, %arg1: i32) -> (i32, i32) {
    %c0_i32 = arith.constant 0 : i32
    %c0_i32_0 = arith.constant 0 : i32
    return %arg0, %c0_i32 : i32, i32
  }
}

module attributes {stable_mosaic.version = 11 : i64} {
  func.func @agg_classifier_kernel(%arg0: i32, %arg1: i32, %arg2: memref<128x128xbf16, #tpu.memory_space<vmem>>, %arg3: memref<128x128xbf16, #tpu.memory_space<vmem>>, %arg4: memref<1x128xf32, #tpu.memory_space<vmem>>, %arg5: memref<1x128xf32, #tpu.memory_space<vmem>>, %arg6: memref<128x128xf32, #tpu.memory_space<vmem>>, %arg7: memref<1x128xf32, #tpu.memory_space<vmem>>, %arg8: memref<128x128xf32, #tpu.memory_space<vmem>>, %arg9: memref<1x128xf32, #tpu.memory_space<vmem>>, %arg10: memref<128x128xf32, #tpu.memory_space<vmem>>, %arg11: memref<128x128xf32, #tpu.memory_space<vmem>>) attributes {dimension_semantics = [#tpu.dimension_semantics<parallel>, #tpu.dimension_semantics<arbitrary>], iteration_bounds = array<i64: 2, 2>, scalar_prefetch = 0 : i64, scratch_operands = 1 : i64, tpu.core_type = #tpu.core_type<tc>, window_params = [{transform_indices = @transform_0, window_bounds = array<i64: 128, 128>}, {transform_indices = @transform_1, window_bounds = array<i64: 128, 128>}, {pipeline_mode = #tpu.pipeline_mode<synchronous>, transform_indices = @transform_2, window_bounds = array<i64: 1, 128>}, {pipeline_mode = #tpu.pipeline_mode<synchronous>, transform_indices = @transform_3, window_bounds = array<i64: 1, 128>}, {pipeline_mode = #tpu.pipeline_mode<synchronous>, transform_indices = @transform_4, window_bounds = array<i64: 128, 128>}, {pipeline_mode = #tpu.pipeline_mode<synchronous>, transform_indices = @transform_5, window_bounds = array<i64: 1, 128>}, {pipeline_mode = #tpu.pipeline_mode<synchronous>, transform_indices = @transform_6, window_bounds = array<i64: 128, 128>}, {pipeline_mode = #tpu.pipeline_mode<synchronous>, transform_indices = @transform_7, window_bounds = array<i64: 1, 128>}, {transform_indices = @transform_8, window_bounds = array<i64: 128, 128>}]} {
    %c0_i32 = arith.constant 0 : i32
    %0 = arith.cmpi eq, %arg1, %c0_i32 : i32
    %1 = arith.extui %0 : i1 to i32
    %c0_i32_0 = arith.constant 0 : i32
    %2 = arith.cmpi ne, %1, %c0_i32_0 : i32
    scf.if %2 {
      %cst_9 = arith.constant 0.000000e+00 : f32
      %12 = vector.broadcast %cst_9 : f32 to vector<128x128xf32>
      %c0_10 = arith.constant 0 : index
      %c0_11 = arith.constant 0 : index
      %13 = vector.load %arg11[%c0_10, %c0_11] : memref<128x128xf32, #tpu.memory_space<vmem>>, vector<128x128xf32>
      tpu.vector_store %arg11[%c0_10, %c0_11], %12 {strides = array<i32>} : memref<128x128xf32, #tpu.memory_space<vmem>>, vector<128x128xf32>,
    } else {
    }
    %c0 = arith.constant 0 : index
    %c0_1 = arith.constant 0 : index
    %3 = vector.load %arg11[%c0, %c0_1] : memref<128x128xf32, #tpu.memory_space<vmem>>, vector<128x128xf32>
    %c0_2 = arith.constant 0 : index
    %c0_3 = arith.constant 0 : index
    %4 = vector.load %arg2[%c0_2, %c0_3] : memref<128x128xbf16, #tpu.memory_space<vmem>>, vector<128x128xbf16>
    %c0_4 = arith.constant 0 : index
    %c0_5 = arith.constant 0 : index
    %5 = vector.load %arg3[%c0_4, %c0_5] : memref<128x128xbf16, #tpu.memory_space<vmem>>, vector<128x128xbf16>
    %cst = arith.constant dense<0.000000e+00> : vector<128x128xf32>
    %6 = tpu.matmul %4, %5, %cst {dimension_numbers = #tpu.dot_dimension_numbers<[1], [0], [0], [1], [0, 0, 1, 1], [], []>} : vector<128x128xbf16>, vector<128x128xbf16>, vector<128x128xf32> -> vector<128x128xf32>
    %7 = arith.addf %3, %6 : vector<128x128xf32>
    %c0_6 = arith.constant 0 : index
    %c0_7 = arith.constant 0 : index
    %8 = vector.load %arg11[%c0_6, %c0_7] : memref<128x128xf32, #tpu.memory_space<vmem>>, vector<128x128xf32>
    tpu.vector_store %arg11[%c0_6, %c0_7], %7 {strides = array<i32>} : memref<128x128xf32, #tpu.memory_space<vmem>>, vector<128x128xf32>,
    %c1_i32 = arith.constant 1 : i32
    %9 = arith.cmpi eq, %arg1, %c1_i32 : i32
    %10 = arith.extui %9 : i1 to i32
    %c0_i32_8 = arith.constant 0 : i32
    %11 = arith.cmpi ne, %10, %c0_i32_8 : i32
    scf.if %11 {
      %c0_9 = arith.constant 0 : index
      %c0_10 = arith.constant 0 : index
      %12 = vector.load %arg11[%c0_9, %c0_10] : memref<128x128xf32, #tpu.memory_space<vmem>>, vector<128x128xf32>
      %c0_11 = arith.constant 0 : index
      %c0_12 = arith.constant 0 : index
      %13 = vector.load %arg4[%c0_11, %c0_12] : memref<1x128xf32, #tpu.memory_space<vmem>>, vector<1x128xf32>
      %14 = vector.broadcast %13 : vector<1x128xf32> to vector<128x128xf32>
      %15 = arith.addf %12, %14 : vector<128x128xf32>
      %cst_13 = arith.constant 0.000000e+00 : f32
      %16 = vector.broadcast %cst_13 : f32 to vector<128x128xf32>
      %17 = arith.cmpf oge, %15, %16 : vector<128x128xf32>
      %c0_14 = arith.constant 0 : index
      %c0_15 = arith.constant 0 : index
      %18 = vector.load %arg5[%c0_14, %c0_15] : memref<1x128xf32, #tpu.memory_space<vmem>>, vector<1x128xf32>
      %19 = vector.broadcast %18 : vector<1x128xf32> to vector<128x128xf32>
      %20 = arith.mulf %19, %15 : vector<128x128xf32>
      %21 = arith.select %17, %15, %20 : vector<128x128xi1>, vector<128x128xf32>
      %c0_16 = arith.constant 0 : index
      %c0_17 = arith.constant 0 : index
      %22 = vector.load %arg6[%c0_16, %c0_17] : memref<128x128xf32, #tpu.memory_space<vmem>>, vector<128x128xf32>
      %cst_18 = arith.constant dense<0.000000e+00> : vector<128x128xf32>
      %23 = tpu.matmul %21, %22, %cst_18 {dimension_numbers = #tpu.dot_dimension_numbers<[1], [0], [0], [1], [0, 0, 1, 1], [], []>} : vector<128x128xf32>, vector<128x128xf32>, vector<128x128xf32> -> vector<128x128xf32>
      %c0_19 = arith.constant 0 : index
      %c0_20 = arith.constant 0 : index
      %24 = vector.load %arg7[%c0_19, %c0_20] : memref<1x128xf32, #tpu.memory_space<vmem>>, vector<1x128xf32>
      %25 = vector.broadcast %24 : vector<1x128xf32> to vector<128x128xf32>
      %26 = arith.addf %23, %25 : vector<128x128xf32>
      %cst_21 = arith.constant 0.000000e+00 : f32
      %27 = vector.broadcast %cst_21 : f32 to vector<128x128xf32>
      %28 = arith.maximumf %26, %27 : vector<128x128xf32>
      %c0_22 = arith.constant 0 : index
      %c0_23 = arith.constant 0 : index
      %29 = vector.load %arg8[%c0_22, %c0_23] : memref<128x128xf32, #tpu.memory_space<vmem>>, vector<128x128xf32>
      %cst_24 = arith.constant dense<0.000000e+00> : vector<128x128xf32>
      %30 = tpu.matmul %28, %29, %cst_24 {dimension_numbers = #tpu.dot_dimension_numbers<[1], [0], [0], [1], [0, 0, 1, 1], [], []>} : vector<128x128xf32>, vector<128x128xf32>, vector<128x128xf32> -> vector<128x128xf32>
      %c0_25 = arith.constant 0 : index
      %c0_26 = arith.constant 0 : index
      %31 = vector.load %arg9[%c0_25, %c0_26] : memref<1x128xf32, #tpu.memory_space<vmem>>, vector<1x128xf32>
      %32 = vector.broadcast %31 : vector<1x128xf32> to vector<128x128xf32>
      %33 = arith.addf %30, %32 : vector<128x128xf32>
      %c0_27 = arith.constant 0 : index
      %c0_28 = arith.constant 0 : index
      %34 = vector.load %arg10[%c0_27, %c0_28] : memref<128x128xf32, #tpu.memory_space<vmem>>, vector<128x128xf32>
      tpu.vector_store %arg10[%c0_27, %c0_28], %33 {strides = array<i32>} : memref<128x128xf32, #tpu.memory_space<vmem>>, vector<128x128xf32>,
    } else {
    }
    return
  }
  func.func @transform_0(%arg0: i32, %arg1: i32) -> (i32, i32) {
    %c0_i32 = arith.constant 0 : i32
    return %arg0, %arg1 : i32, i32
  }
  func.func @transform_1(%arg0: i32, %arg1: i32) -> (i32, i32) {
    %c0_i32 = arith.constant 0 : i32
    %c0_i32_0 = arith.constant 0 : i32
    return %arg1, %c0_i32 : i32, i32
  }
  func.func @transform_2(%arg0: i32, %arg1: i32) -> (i32, i32) {
    %c0_i32 = arith.constant 0 : i32
    %c0_i32_0 = arith.constant 0 : i32
    %c0_i32_1 = arith.constant 0 : i32
    return %c0_i32, %c0_i32_0 : i32, i32
  }
  func.func @transform_3(%arg0: i32, %arg1: i32) -> (i32, i32) {
    %c0_i32 = arith.constant 0 : i32
    %c0_i32_0 = arith.constant 0 : i32
    %c0_i32_1 = arith.constant 0 : i32
    return %c0_i32, %c0_i32_0 : i32, i32
  }
  func.func @transform_4(%arg0: i32, %arg1: i32) -> (i32, i32) {
    %c0_i32 = arith.constant 0 : i32
    %c0_i32_0 = arith.constant 0 : i32
    %c0_i32_1 = arith.constant 0 : i32
    return %c0_i32, %c0_i32_0 : i32, i32
  }
  func.func @transform_5(%arg0: i32, %arg1: i32) -> (i32, i32) {
    %c0_i32 = arith.constant 0 : i32
    %c0_i32_0 = arith.constant 0 : i32
    %c0_i32_1 = arith.constant 0 : i32
    return %c0_i32, %c0_i32_0 : i32, i32
  }
  func.func @transform_6(%arg0: i32, %arg1: i32) -> (i32, i32) {
    %c0_i32 = arith.constant 0 : i32
    %c0_i32_0 = arith.constant 0 : i32
    %c0_i32_1 = arith.constant 0 : i32
    return %c0_i32, %c0_i32_0 : i32, i32
  }
  func.func @transform_7(%arg0: i32, %arg1: i32) -> (i32, i32) {
    %c0_i32 = arith.constant 0 : i32
    %c0_i32_0 = arith.constant 0 : i32
    %c0_i32_1 = arith.constant 0 : i32
    return %c0_i32, %c0_i32_0 : i32, i32
  }
  func.func @transform_8(%arg0: i32, %arg1: i32) -> (i32, i32) {
    %c0_i32 = arith.constant 0 : i32
    %c0_i32_0 = arith.constant 0 : i32
    return %arg0, %c0_i32 : i32, i32
  }
}

</mosaic_0001>

<bundles_post_ra>
// kernel: gcn_node_classif.3
= control target key start
LH: loop header
LB: loop body
LE: loop exit
PB: predicated region body
PF: predicated region fallthrough
CT: control target
= control target key end

     0   :  { %s469_s9 = smov 0   ;;  %s558_s0 = inlined_call_operand.vmem [shape: f32[256,128], index: 0, kind: input, shape index: {}]   ;;  %s559_s1 = inlined_call_operand.vmem [shape: f32[128,128], index: 1, kind: input, shape index: {}]   ;;  %s560_s2 = inlined_call_operand.vmem [shape: bf16[256,128], index: 2, kind: output, shape index: {}]  }
   0x1 LB: > { %s332_s10 = sadd.s32 4294967295, %s452_s9   ;;  %p336_p0 = scmp.ge.s32.totalorder %s452_s9, 1  ;;  %s452_s9 = sphi %s469_s9, %s12_s9  }
   0x2   : > { %p113_p1 = scmp.lt.s32.totalorder %s452_s9, 3 }
   0x4   : > { %p114_p2 = pnand %p336_p0, %p113_p1 }
   0x5   : > { %s337_s27 = sshll.u32 (!%p114_p2), %s332_s10, 4 }
   0x6   : > { %117 = sbr.rel (%p114_p2) target bundleno = 205 (0xcd), region = 28  ;;  %p136_p3 = scmp.lt.s32.totalorder (!%p114_p2), %s337_s27, 31 }
   0xb   : > { %v178_v0 = vld [vmem:[%s559_s1 + $0x78] sm:$0xff]  ;;  %v177_v1 = vld [vmem:[%s559_s1 + $0x70] sm:$0xff]  ;;  %v176_v2 = vld [vmem:[%s559_s1 + $0x68] sm:$0xff]  ;;  %s562_s27 = smov (!%p136_p3, %s337_s27), 31 }
   0xc   : > { %179 = vmatpush.msra.mxu0 %v178_v0  ;;  %390 = vmatpush.msra.mxu1 %v178_v0  ;;  %v175_v3 = vld [vmem:[%s559_s1 + $0x60] sm:$0xff]  ;;  %v174_v4 = vld [vmem:[%s559_s1 + $0x58] sm:$0xff]  ;;  %v173_v5 = vld [vmem:[%s559_s1 + $0x50] sm:$0xff]  ;;  %s338_s13 = sshll.u32 %s562_s27, 3  ;;  %s340_s21 = sshll.u32 %s562_s27, 2 }
   0xd   : > { %391 = vmatpush.msra.mxu2 %v178_v0  ;;  %392 = vmatpush.msra.mxu3 %v178_v0  ;;  %v172_v6 = vld [vmem:[%s559_s1 + $0x48] sm:$0xff]  ;;  %v171_v7 = vld [vmem:[%s559_s1 + $0x40] sm:$0xff]  ;;  %v170_v8 = vld [vmem:[%s559_s1 + $0x38] sm:$0xff]  ;;  %s530_s18 = scalar_lea.vmem %s558_s0, %s338_s13  ;;  %s145_s24 = scalar_lea.vmem %s560_s2, %s340_s21 }
   0xe   : > { %180 = vmatpush.msra.mxu0 %v177_v1  ;;  %393 = vmatpush.msra.mxu1 %v177_v1  ;;  %v169_v9 = vld [vmem:[%s559_s1 + $0x30] sm:$0xff]  ;;  %v168_v10 = vld [vmem:[%s559_s1 + $0x28] sm:$0xff]  ;;  %v167_v11 = vld [vmem:[%s559_s1 + $0x20] sm:$0xff] }
   0xf   : > { %394 = vmatpush.msra.mxu2 %v177_v1  ;;  %395 = vmatpush.msra.mxu3 %v177_v1  ;;  %v166_v12 = vld [vmem:[%s559_s1 + $0x18] sm:$0xff]  ;;  %v165_v13 = vld [vmem:[%s559_s1 + $0x10] sm:$0xff]  ;;  %v164_v14 = vld [vmem:[%s559_s1 + $0x8] sm:$0xff] }
  0x10   : > { %181 = vmatpush.msra.mxu0 %v176_v2  ;;  %396 = vmatpush.msra.mxu1 %v176_v2  ;;  %v163_v15 = vld [vmem:[%s559_s1] sm:$0xff]  ;;  %v148_v20 = vld [vmem:[%s530_s18 + $0x8] sm:$0xff]  ;;  %v149_v24 = vld [vmem:[%s530_s18 + $0x10] sm:$0xff] }
  0x11   : > { %397 = vmatpush.msra.mxu2 %v176_v2  ;;  %398 = vmatpush.msra.mxu3 %v176_v2  ;;  %v147_v16 = vld [vmem:[%s530_s18] sm:$0xff]  ;;  %v152_v21 = vld [vmem:[%s530_s18 + $0x28] sm:$0xff]  ;;  %v153_v25 = vld [vmem:[%s530_s18 + $0x30] sm:$0xff] }
  0x12   : > { %182 = vmatpush.msra.mxu0 %v175_v3  ;;  %399 = vmatpush.msra.mxu1 %v175_v3  ;;  %v151_v17 = vld [vmem:[%s530_s18 + $0x20] sm:$0xff]  ;;  %v156_v22 = vld [vmem:[%s530_s18 + $0x48] sm:$0xff]  ;;  %v157_v26 = vld [vmem:[%s530_s18 + $0x50] sm:$0xff] }
  0x13   : > { %400 = vmatpush.msra.mxu2 %v175_v3  ;;  %401 = vmatpush.msra.mxu3 %v175_v3  ;;  %v155_v18 = vld [vmem:[%s530_s18 + $0x40] sm:$0xff]  ;;  %v160_v23 = vld [vmem:[%s530_s18 + $0x68] sm:$0xff]  ;;  %v161_v27 = vld [vmem:[%s530_s18 + $0x70] sm:$0xff] }
  0x14   : > { %183 = vmatpush.msra.mxu0 %v174_v4  ;;  %402 = vmatpush.msra.mxu1 %v174_v4  ;;  %v159_v19 = vld [vmem:[%s530_s18 + $0x60] sm:$0xff]  ;;  %v150_v28 = vld [vmem:[%s530_s18 + $0x18] sm:$0xff] }
  0x15   : > { %403 = vmatpush.msra.mxu2 %v174_v4  ;;  %404 = vmatpush.msra.mxu3 %v174_v4  ;;  %v154_v29 = vld [vmem:[%s530_s18 + $0x38] sm:$0xff] }
  0x16   : > { %184 = vmatpush.msra.mxu0 %v173_v5  ;;  %405 = vmatpush.msra.mxu1 %v173_v5  ;;  %v158_v30 = vld [vmem:[%s530_s18 + $0x58] sm:$0xff] }
  0x17   : > { %406 = vmatpush.msra.mxu2 %v173_v5  ;;  %407 = vmatpush.msra.mxu3 %v173_v5  ;;  %v162_v31 = vld [vmem:[%s530_s18 + $0x78] sm:$0xff] }
  0x18   : > { %185 = vmatpush.msra.mxu0 %v172_v6  ;;  %408 = vmatpush.msra.mxu1 %v172_v6 }
  0x19   : > { %409 = vmatpush.msra.mxu2 %v172_v6  ;;  %410 = vmatpush.msra.mxu3 %v172_v6 }
  0x1a   : > { %186 = vmatpush.msra.mxu0 %v171_v7  ;;  %411 = vmatpush.msra.mxu1 %v171_v7 }
  0x1b   : > { %412 = vmatpush.msra.mxu2 %v171_v7  ;;  %413 = vmatpush.msra.mxu3 %v171_v7 }
  0x1c   : > { %187 = vmatpush.msra.mxu0 %v170_v8  ;;  %414 = vmatpush.msra.mxu1 %v170_v8 }
  0x1d   : > { %415 = vmatpush.msra.mxu2 %v170_v8  ;;  %416 = vmatpush.msra.mxu3 %v170_v8 }
  0x1e   : > { %188 = vmatpush.msra.mxu0 %v169_v9  ;;  %417 = vmatpush.msra.mxu1 %v169_v9 }
  0x1f   : > { %418 = vmatpush.msra.mxu2 %v169_v9  ;;  %419 = vmatpush.msra.mxu3 %v169_v9 }
  0x20   : > { %189 = vmatpush.msra.mxu0 %v168_v10  ;;  %420 = vmatpush.msra.mxu1 %v168_v10 }
  0x21   : > { %421 = vmatpush.msra.mxu2 %v168_v10  ;;  %422 = vmatpush.msra.mxu3 %v168_v10 }
  0x22   : > { %190 = vmatpush.msra.mxu0 %v167_v11  ;;  %423 = vmatpush.msra.mxu1 %v167_v11 }
  0x23   : > { %424 = vmatpush.msra.mxu2 %v167_v11  ;;  %425 = vmatpush.msra.mxu3 %v167_v11 }
  0x24   : > { %191 = vmatpush.msra.mxu0 %v166_v12  ;;  %426 = vmatpush.msra.mxu1 %v166_v12 }
  0x25   : > { %427 = vmatpush.msra.mxu2 %v166_v12  ;;  %428 = vmatpush.msra.mxu3 %v166_v12 }
  0x26   : > { %192 = vmatpush.msra.mxu0 %v165_v13  ;;  %429 = vmatpush.msra.mxu1 %v165_v13 }
  0x27   : > { %430 = vmatpush.msra.mxu2 %v165_v13  ;;  %431 = vmatpush.msra.mxu3 %v165_v13 }
  0x28   : > { %193 = vmatpush.msra.mxu0 %v164_v14  ;;  %432 = vmatpush.msra.mxu1 %v164_v14 }
  0x29   : > { %433 = vmatpush.msra.mxu2 %v164_v14  ;;  %434 = vmatpush.msra.mxu3 %v164_v14 }
  0x2a   : > { %194 = vmatpush.msra.mxu0 %v163_v15  ;;  %435 = vmatpush.msra.mxu1 %v163_v15 }
  0x2b   : > { %436 = vmatpush.msra.mxu2 %v163_v15  ;;  %437 = vmatpush.msra.mxu3 %v163_v15 }
  0x2c   : > { %195 = vmatmul.f32.vlgmr.msra.gmra.mxu0 %v147_v16  ;;  %207 = vmatmul.f32.vlgmr.msra.gmra.mxu1 %v151_v17 }
  0x2d   : > { %219 = vmatmul.f32.vlgmr.msra.gmra.mxu2 %v155_v18  ;;  %231 = vmatmul.f32.vlgmr.msra.gmra.mxu3 %v159_v19 }
  0x34   : > { %198 = vmatmul.f32.gmra.mxu0 %v148_v20  ;;  %210 = vmatmul.f32.gmra.mxu1 %v152_v21 }
  0x35   : > { %222 = vmatmul.f32.gmra.mxu2 %v156_v22  ;;  %234 = vmatmul.f32.gmra.mxu3 %v160_v23 }
  0x3c   : > { %201 = vmatmul.f32.gmra.mxu0 %v149_v24  ;;  %213 = vmatmul.f32.gmra.mxu1 %v153_v25 }
  0x3d   : > { %225 = vmatmul.f32.gmra.mxu2 %v157_v26  ;;  %237 = vmatmul.f32.gmra.mxu3 %v161_v27 }
  0x44   : > { %204 = vmatmul.f32.gmra.mxu0 %v150_v28  ;;  %216 = vmatmul.f32.gmra.mxu1 %v154_v29 }
  0x45   : > { %228 = vmatmul.f32.gmra.mxu2 %v158_v30  ;;  %240 = vmatmul.f32.gmra.mxu3 %v162_v31 }
  0xa9   : > { %v196_v32 = vpop.f32.mrf.mxu0  ;;  %v208_v33 = vpop.f32.mrf.mxu1 }
  0xb0   : > { %v220_v34 = vpop.f32.mrf.mxu2  ;;  %v232_v35 = vpop.f32.mrf.mxu3 }
  0xb1   : > { %v199_v36 = vpop.f32.mrf.mxu0  ;;  %v211_v37 = vpop.f32.mrf.mxu1 }
  0xb2   : > { %v346_v38 = vpack.c.bf16 %v199_v36, %v196_v32  ;;  %v356_v39 = vpack.c.bf16 %v211_v37, %v208_v33 }
  0xb4   : > { %347 = vst [vmem:[%s145_s24] sm:$0xff] %v346_v38  }
  0xb5   : > { %384 = vst [vmem:[%s145_s24 + $0x10] sm:$0xff] %v356_v39  }
  0xb8   : > { %v223_v40 = vpop.f32.mrf.mxu2  ;;  %v235_v41 = vpop.f32.mrf.mxu3 }
  0xb9   : > { %v366_v42 = vpack.c.bf16 %v223_v40, %v220_v34  ;;  %v376_v43 = vpack.c.bf16 %v235_v41, %v232_v35  ;;  %v202_v44 = vpop.f32.mrf.mxu0  ;;  %v214_v45 = vpop.f32.mrf.mxu1 }
  0xbb   : > { %386 = vst [vmem:[%s145_s24 + $0x20] sm:$0xff] %v366_v42  }
  0xbc   : > { %388 = vst [vmem:[%s145_s24 + $0x30] sm:$0xff] %v376_v43  }
  0xc0   : > { %v226_v46 = vpop.f32.mrf.mxu2  ;;  %v238_v47 = vpop.f32.mrf.mxu3 }
  0xc1   : > { %v205_v48 = vpop.f32.mrf.mxu0  ;;  %v217_v49 = vpop.f32.mrf.mxu1 }
  0xc2   : > { %v351_v50 = vpack.c.bf16 %v205_v48, %v202_v44  ;;  %v361_v51 = vpack.c.bf16 %v217_v49, %v214_v45 }
  0xc4   : > { %383 = vst [vmem:[%s145_s24 + $0x8] sm:$0xff] %v351_v50  }
  0xc5   : > { %385 = vst [vmem:[%s145_s24 + $0x18] sm:$0xff] %v361_v51  }
  0xc8   : > { %v229_v52 = vpop.f32.mrf.mxu2  ;;  %v241_v53 = vpop.f32.mrf.mxu3 }
  0xc9   : > { %v371_v54 = vpack.c.bf16 %v229_v52, %v226_v46  ;;  %v381_v55 = vpack.c.bf16 %v241_v53, %v238_v47 }
  0xcb   : > { %387 = vst [vmem:[%s145_s24 + $0x28] sm:$0xff] %v371_v54  }
  0xcc   : > { %389 = vst [vmem:[%s145_s24 + $0x38] sm:$0xff] %v381_v55  }
  0xcd PF: > { %s12_s9 = sadd.s32 1, %s452_s9  }
  0xce   : > { %p9_p4 = scmp.ge.s32.totalorder %s12_s9, 4  }
  0xd0   :  { %11 = sbr.rel (!%p9_p4) target bundleno = 1 (0x1), region = 58 }

// kernel: gcn_node_classif.4
= control target key start
LH: loop header
LB: loop body
LE: loop exit
PB: predicated region body
PF: predicated region fallthrough
CT: control target
= control target key end

     0   :  { %s1271_s18 = smov 0   ;;  %s1273_s19 = smov 0   ;;  %s1506_s0 = inlined_call_operand.vmem [shape: bf16[256,256], index: 0, kind: input, shape index: {}]   ;;  %s1507_s1 = inlined_call_operand.vmem [shape: bf16[256,128], index: 1, kind: input, shape index: {}]   ;;  %s1508_s2 = inlined_call_operand.vmem [shape: f32[1,128], index: 2, kind: input, shape index: {}]   ;;  %s1509_s3 = inlined_call_operand.vmem [shape: f32[1,128], index: 3, kind: input, shape index: {}]   ;;  %s1510_s4 = inlined_call_operand.vmem [shape: f32[128,128], index: 4, kind: input, shape index: {}]   ;;  %s1511_s5 = inlined_call_operand.vmem [shape: bf16[256,128], index: 5, kind: output, shape index: {}]  }
   0x1   :  { %s1275_s20 = smov 0   ;;  %s1277_s21 = smov 0  }
   0x2   :  { %s1279_s22 = smov 0   ;;  %s1281_s23 = smov 0  }
   0x3   :  { %s1283_s24 = smov 0  }
   0x4 LB: > { %s24_s25 = sadd.s32 1, %s1230_s22  ;;  %s27_s26 = sadd.s32 1, %s1234_s23  ;;  %s1238_s24 = sphi %s1283_s24, %s15_s24   ;;  %s1234_s23 = sphi %s1281_s23, %s1517_s23   ;;  %s1230_s22 = sphi %s1279_s22, %s1516_s22   ;;  %s1226_s21 = sphi %s1277_s21, %s1515_s21   ;;  %s1222_s20 = sphi %s1275_s20, %s1514_s20   ;;  %s1218_s19 = sphi %s1273_s19, %s1513_s19   ;;  %s1214_s18 = sphi %s1271_s18, %s1512_s18  }
   0x5   : > { %p25_p0 = scmp.ge.s32.totalorder %s24_s25, 2  ;;  %p43_p1 = scmp.ne.s32.totalorder %s1218_s19, %s1214_s18 }
   0x6   : > { %p44_p2 = scmp.eq.s32.totalorder %s1238_s24, 0  ;;  %s36_s30 = sadd.s32 1, %s1218_s19 }
   0x7   : > { %s1519_s25 = smov (%p25_p0, %s24_s25), 0  ;;  %s1521_s26 = smov (!%p25_p0, %s27_s26), %s1234_s23 }
   0x8   : > { %p45_p3 = por %p44_p2, %p43_p1  ;;  %p29_p4 = scmp.ge.s32.totalorder %s1521_s26, 2 }
   0x9   : > { %s32_s27 = ssub.s32 %s1230_s22, %s1519_s25  ;;  %p910_p6 = scmp.ge.s32.totalorder %s1238_s24, 4 }
   0xa   : > { %s1523_s26 = smov (%p29_p4, %s1521_s26), 0 }
   0xb   : > { %s31_s28 = ssub.s32 %s1234_s23, %s1523_s26  ;;  %193 = sbr.rel (%p910_p6) target bundleno = 38 (0x26), region = 28 }
   0xc   : > { %s33_s29 = sor.u32 %s32_s27, %s31_s28 }
   0xd   : > { %p34_p5 = scmp.eq.s32.totalorder %s33_s29, 0 }
   0xf   : > { %s1322_s6 = scalar_select %p34_p5, %s1218_s19, %s36_s30  }
  0x10   : > { %196 = sbr.rel (!%p45_p3) target bundleno = 38 (0x26), region = 32  ;;  %s198_s7 = sand.u32 (%p45_p3), 1, %s1218_s19  }
  0x11   : > { %s989_s8 = sshll.u32 (%p45_p3), %s1234_s23, 5  ;;  %s911_s9 = sshll.u32 (%p45_p3), %s198_s7, 6 }
  0x12   : > { %s203_s10 = sadd.s32 (%p45_p3), %s1230_s22, %s989_s8  ;;  %s200_s15 = scalar_lea.vmem (%p45_p3), [#allocation3], %s911_s9 }
  0x13   : > { %s914_s11 = sshll.u32 (%p45_p3), %s203_s10, 2 }
  0x14   : > { %s1331_s14 = scalar_lea.vmem (%p45_p3), %s1506_s0, %s914_s11 }
  0x15   : > { %v222_v0 = vld [vmem:[%s1331_s14] sm:$0xf]  ;;  %v224_v1 = vld [vmem:[%s1331_s14 + $0x8] sm:$0xf]  ;;  %v226_v2 = vld [vmem:[%s1331_s14 + $0x10] sm:$0xf] }
  0x16   : > { %223 = vst [vmem:[%s200_s15] sm:$0xf] %v222_v0  ;;  %v228_v3 = vld [vmem:[%s1331_s14 + $0x18] sm:$0xf]  ;;  %v230_v4 = vld [vmem:[%s1331_s14 + $0x20] sm:$0xf] }
  0x17   : > { %225 = vst [vmem:[%s200_s15 + $0x4] sm:$0xf] %v224_v1  ;;  %v232_v5 = vld [vmem:[%s1331_s14 + $0x28] sm:$0xf]  ;;  %v234_v6 = vld [vmem:[%s1331_s14 + $0x30] sm:$0xf] }
  0x18   : > { %227 = vst [vmem:[%s200_s15 + $0x8] sm:$0xf] %v226_v2  ;;  %v236_v7 = vld [vmem:[%s1331_s14 + $0x38] sm:$0xf]  ;;  %v238_v8 = vld [vmem:[%s1331_s14 + $0x40] sm:$0xf] }
  0x19   : > { %229 = vst [vmem:[%s200_s15 + $0xc] sm:$0xf] %v228_v3  ;;  %v240_v9 = vld [vmem:[%s1331_s14 + $0x48] sm:$0xf]  ;;  %v242_v10 = vld [vmem:[%s1331_s14 + $0x50] sm:$0xf] }
  0x1a   : > { %231 = vst [vmem:[%s200_s15 + $0x10] sm:$0xf] %v230_v4  ;;  %v244_v11 = vld [vmem:[%s1331_s14 + $0x58] sm:$0xf]  ;;  %v246_v12 = vld [vmem:[%s1331_s14 + $0x60] sm:$0xf] }
  0x1b   : > { %233 = vst [vmem:[%s200_s15 + $0x14] sm:$0xf] %v232_v5  ;;  %v248_v13 = vld [vmem:[%s1331_s14 + $0x68] sm:$0xf]  ;;  %v250_v14 = vld [vmem:[%s1331_s14 + $0x70] sm:$0xf] }
  0x1c   : > { %235 = vst [vmem:[%s200_s15 + $0x18] sm:$0xf] %v234_v6  ;;  %v252_v15 = vld [vmem:[%s1331_s14 + $0x78] sm:$0xf] }
  0x1d   : > { %237 = vst [vmem:[%s200_s15 + $0x1c] sm:$0xf] %v236_v7 }
  0x1e   : > { %239 = vst [vmem:[%s200_s15 + $0x20] sm:$0xf] %v238_v8 }
  0x1f   : > { %241 = vst [vmem:[%s200_s15 + $0x24] sm:$0xf] %v240_v9 }
  0x20   : > { %243 = vst [vmem:[%s200_s15 + $0x28] sm:$0xf] %v242_v10 }
  0x21   : > { %245 = vst [vmem:[%s200_s15 + $0x2c] sm:$0xf] %v244_v11 }
  0x22   : > { %247 = vst [vmem:[%s200_s15 + $0x30] sm:$0xf] %v246_v12 }
  0x23   : > { %249 = vst [vmem:[%s200_s15 + $0x34] sm:$0xf] %v248_v13 }
  0x24   : > { %251 = vst [vmem:[%s200_s15 + $0x38] sm:$0xf] %v250_v14 }
  0x25   : > { %253 = vst [vmem:[%s200_s15 + $0x3c] sm:$0xf] %v252_v15 }
  0x26 PF: > { %p915_p7 = scmp.ge.s32.totalorder %s1238_s24, 1  ;;  %p317_p8 = scmp.lt.s32.totalorder %s1238_s24, 5 }
  0x28   : > { %p318_p9 = pnand %p915_p7, %p317_p8 }
  0x29   : > { %s324_s16 = sand.u32 (!%p318_p9), 1, %s1214_s18   ;;  %s917_s17 = sshll.u32 (!%p318_p9), %s1222_s20, 4 }
  0x2a   : > { %321 = sbr.rel (%p318_p9) target bundleno = 459 (0x1cb), region = 77  ;;  %s916_s27 = sshll.u32 (!%p318_p9), %s324_s16, 6 }
  0x2b   : > { %p358_p10 = scmp.lt.s32.totalorder (!%p318_p9), %s917_s17, 31  ;;  %s919_s28 = sshll.u32 (!%p318_p9), %s1226_s21, 4 }
  0x2c   : > { %p364_p11 = scmp.lt.s32.totalorder (!%p318_p9), %s919_s28, 31  ;;  %s1364_s18 = scalar_lea.vmem (!%p318_p9), [#allocation3], %s916_s27 }
  0x2d   : > { %p921_p12 = scmp.ne.s32.totalorder (!%p318_p9), %s1222_s20, 0 }
  0x2f   : > { %s1525_s17 = smov (!%p358_p10, %s917_s17), 31  ;;  %s1527_s28 = smov (!%p364_p11, %s919_s28), 31 }
  0x30   : > { %s918_s29 = sshll.u32 %s1525_s17, 2  ;;  %s920_s9 = sshll.u32 %s1527_s28, 2 }
  0x31   : > { %s1357_s8 = scalar_lea.vmem %s1507_s1, %s918_s29  ;;  %s1362_s12 = scalar_lea.vmem %s1511_s5, %s920_s9 }
  0x32   : > { %372 = sbr.rel (%p921_p12) target bundleno = 72 (0x48), region = 85 }
  0x37   : > { %v1240_v16 = vmov 0.0  }
  0x38   : > { %373 = vst [vmem:[#allocation2 + $0x30] sm:$0xff] %v1240_v16 }
  0x39   : > { %374 = vst [vmem:[#allocation2] sm:$0xff] %v1240_v16 }
  0x3a   : > { %375 = vst [vmem:[#allocation2 + $0x58] sm:$0xff] %v1240_v16 }
  0x3b   : > { %376 = vst [vmem:[#allocation2 + $0x18] sm:$0xff] %v1240_v16 }
  0x3c   : > { %377 = vst [vmem:[#allocation2 + $0x50] sm:$0xff] %v1240_v16 }
  0x3d   : > { %378 = vst [vmem:[#allocation2 + $0x68] sm:$0xff] %v1240_v16 }
  0x3e   : > { %379 = vst [vmem:[#allocation2 + $0x8] sm:$0xff] %v1240_v16 }
  0x3f   : > { %380 = vst [vmem:[#allocation2 + $0x48] sm:$0xff] %v1240_v16 }
  0x40   : > { %381 = vst [vmem:[#allocation2 + $0x40] sm:$0xff] %v1240_v16 }
  0x41   : > { %382 = vst [vmem:[#allocation2 + $0x20] sm:$0xff] %v1240_v16 }
  0x42   : > { %383 = vst [vmem:[#allocation2 + $0x10] sm:$0xff] %v1240_v16 }
  0x43   : > { %384 = vst [vmem:[#allocation2 + $0x38] sm:$0xff] %v1240_v16 }
  0x44   : > { %385 = vst [vmem:[#allocation2 + $0x60] sm:$0xff] %v1240_v16 }
  0x45   : > { %386 = vst [vmem:[#allocation2 + $0x70] sm:$0xff] %v1240_v16 }
  0x46   : > { %387 = vst [vmem:[#allocation2 + $0x78] sm:$0xff] %v1240_v16 }
  0x47   : > { %388 = vst [vmem:[#allocation2 + $0x28] sm:$0xff] %v1240_v16 }
  0x48 PF: > { %v1005_v17 = vld [vmem:[%s1357_s8 + $0x38] sm:$0xff]  ;;  %v1004_v18 = vld [vmem:[%s1357_s8 + $0x30] sm:$0xff]  ;;  %v1003_v19 = vld [vmem:[%s1357_s8 + $0x28] sm:$0xff]  ;;  %p986_p13 = scmp.ne.s32.totalorder %s1222_s20, 1 }
  0x49   : > { %533 = vmatpush.bf16.msra.mxu0 %v1005_v17  ;;  %1053 = vmatpush.bf16.msra.mxu1 %v1005_v17  ;;  %v1002_v20 = vld [vmem:[%s1357_s8 + $0x20] sm:$0xff]  ;;  %v1001_v21 = vld [vmem:[%s1357_s8 + $0x18] sm:$0xff]  ;;  %v1000_v22 = vld [vmem:[%s1357_s8 + $0x10] sm:$0xff] }
  0x4a   : > { %1054 = vmatpush.bf16.msra.mxu2 %v1005_v17  ;;  %1055 = vmatpush.bf16.msra.mxu3 %v1005_v17  ;;  %v999_v23 = vld [vmem:[%s1357_s8 + $0x8] sm:$0xff]  ;;  %v998_v24 = vld [vmem:[%s1357_s8] sm:$0xff]  ;;  %v992_v26 = vld [vmem:[%s1364_s18 + $0x10] sm:$0xff] }
  0x4b   : > { %v990_v25 = vld [vmem:[%s1364_s18] sm:$0xff]  ;;  %v996_v28 = vld [vmem:[%s1364_s18 + $0x30] sm:$0xff]  ;;  %v991_v29 = vld [vmem:[%s1364_s18 + $0x8] sm:$0xff] }
  0x4c   : > { %v994_v27 = vld [vmem:[%s1364_s18 + $0x20] sm:$0xff]  ;;  %v993_v30 = vld [vmem:[%s1364_s18 + $0x18] sm:$0xff]  ;;  %v995_v31 = vld [vmem:[%s1364_s18 + $0x28] sm:$0xff] }
  0x4d   : > { %534 = vmatpush.bf16.msra.mxu0 %v1004_v18  ;;  %1056 = vmatpush.bf16.msra.mxu1 %v1004_v18  ;;  %v997_v32 = vld [vmem:[%s1364_s18 + $0x38] sm:$0xff]  ;;  %v389_v33 = vld [vmem:[#allocation2 + $0x30] sm:$0xff]  ;;  %v397_v39 = vld [vmem:[#allocation2 + $0x40] sm:$0xff] }
  0x4e   : > { %1057 = vmatpush.bf16.msra.mxu2 %v1004_v18  ;;  %1058 = vmatpush.bf16.msra.mxu3 %v1004_v18  ;;  %v393_v34 = vld [vmem:[#allocation2 + $0x50] sm:$0xff]  ;;  %v401_v40 = vld [vmem:[#allocation2 + $0x60] sm:$0xff]  ;;  %v394_v42 = vld [vmem:[#allocation2 + $0x68] sm:$0xff] }
  0x4f   : > { %v390_v41 = vld [vmem:[#allocation2] sm:$0xff]  ;;  %v402_v52 = vld [vmem:[#allocation2 + $0x70] sm:$0xff]  ;;  %v391_v53 = vld [vmem:[#allocation2 + $0x58] sm:$0xff] }
  0x50   : > { %v398_v51 = vld [vmem:[#allocation2 + $0x20] sm:$0xff]  ;;  %v395_v54 = vld [vmem:[#allocation2 + $0x8] sm:$0xff]  ;;  %v399_v63 = vld [vmem:[#allocation2 + $0x10] sm:$0xff] }
  0x51   : > { %535 = vmatpush.bf16.msra.mxu0 %v1003_v19  ;;  %1059 = vmatpush.bf16.msra.mxu1 %v1003_v19  ;;  %v403_v0 = vld [vmem:[#allocation2 + $0x78] sm:$0xff]  ;;  %v396_v2 = vld [vmem:[#allocation2 + $0x48] sm:$0xff] }
  0x52   : > { %1060 = vmatpush.bf16.msra.mxu2 %v1003_v19  ;;  %1061 = vmatpush.bf16.msra.mxu3 %v1003_v19  ;;  %v392_v1 = vld [vmem:[#allocation2 + $0x18] sm:$0xff]  ;;  %v404_v12 = vld [vmem:[#allocation2 + $0x28] sm:$0xff] }
  0x53   : > { %v400_v11 = vld [vmem:[#allocation2 + $0x38] sm:$0xff] }
  0x55   : > { %536 = vmatpush.bf16.msra.mxu0 %v1002_v20  ;;  %1062 = vmatpush.bf16.msra.mxu1 %v1002_v20 }
  0x56   : > { %1063 = vmatpush.bf16.msra.mxu2 %v1002_v20  ;;  %1064 = vmatpush.bf16.msra.mxu3 %v1002_v20 }
  0x59   : > { %537 = vmatpush.bf16.msra.mxu0 %v1001_v21  ;;  %1065 = vmatpush.bf16.msra.mxu1 %v1001_v21 }
  0x5a   : > { %1066 = vmatpush.bf16.msra.mxu2 %v1001_v21  ;;  %1067 = vmatpush.bf16.msra.mxu3 %v1001_v21 }
  0x5d   : > { %538 = vmatpush.bf16.msra.mxu0 %v1000_v22  ;;  %1068 = vmatpush.bf16.msra.mxu1 %v1000_v22 }
  0x5e   : > { %1069 = vmatpush.bf16.msra.mxu2 %v1000_v22  ;;  %1070 = vmatpush.bf16.msra.mxu3 %v1000_v22 }
  0x61   : > { %539 = vmatpush.bf16.msra.mxu0 %v999_v23  ;;  %1071 = vmatpush.bf16.msra.mxu1 %v999_v23 }
  0x62   : > { %1072 = vmatpush.bf16.msra.mxu2 %v999_v23  ;;  %1073 = vmatpush.bf16.msra.mxu3 %v999_v23 }
  0x65   : > { %540 = vmatpush.bf16.msra.mxu0 %v998_v24  ;;  %1074 = vmatpush.bf16.msra.mxu1 %v998_v24 }
  0x66   : > { %1075 = vmatpush.bf16.msra.mxu2 %v998_v24  ;;  %1076 = vmatpush.bf16.msra.mxu3 %v998_v24 }
  0x68   : > { %541 = vmatmul.bf16.vlgmr.msra.gmra.mxu0 %v990_v25  ;;  %551 = vmatmul.bf16.vlgmr.msra.gmra.mxu1 %v992_v26 }
  0x69   : > { %561 = vmatmul.bf16.vlgmr.msra.gmra.mxu2 %v994_v27  ;;  %571 = vmatmul.bf16.vlgmr.msra.gmra.mxu3 %v996_v28 }
  0x78   : > { %546 = vmatmul.bf16.gmra.mxu0 %v991_v29  ;;  %556 = vmatmul.bf16.gmra.mxu1 %v993_v30 }
  0x79   : > { %566 = vmatmul.bf16.gmra.mxu2 %v995_v31  ;;  %576 = vmatmul.bf16.gmra.mxu3 %v997_v32 }
  0xe5   : > { %v542_v35 = vpop.f32.mrf.mxu0  ;;  %v552_v36 = vpop.f32.mrf.mxu1 }
  0xe6   : > { %v582_v37 = vadd.f32 %v542_v35, %v389_v33  ;;  %v586_v38 = vadd.f32 %v552_v36, %v393_v34 }
  0xe8   : > { %598 = vst [vmem:[#allocation2 + $0x30] sm:$0xff] %v582_v37 }
  0xe9   : > { %602 = vst [vmem:[#allocation2 + $0x50] sm:$0xff] %v586_v38 }
  0xec   : > { %v562_v43 = vpop.f32.mrf.mxu2  ;;  %v572_v44 = vpop.f32.mrf.mxu3 }
  0xed   : > { %v590_v45 = vadd.f32 %v562_v43, %v397_v39  ;;  %v594_v46 = vadd.f32 %v572_v44, %v401_v40  ;;  %v544_v47 = vpop.f32.mrf.mxu0  ;;  %v554_v48 = vpop.f32.mrf.mxu1 }
  0xee   : > { %v583_v49 = vadd.f32 %v544_v47, %v390_v41  ;;  %v587_v50 = vadd.f32 %v554_v48, %v394_v42 }
  0xef   : > { %606 = vst [vmem:[#allocation2 + $0x40] sm:$0xff] %v590_v45 }
  0xf0   : > { %610 = vst [vmem:[#allocation2 + $0x60] sm:$0xff] %v594_v46 }
  0xf1   : > { %599 = vst [vmem:[#allocation2] sm:$0xff] %v583_v49 }
  0xf2   : > { %603 = vst [vmem:[#allocation2 + $0x68] sm:$0xff] %v587_v50 }
  0xf4   : > { %v564_v55 = vpop.f32.mrf.mxu2  ;;  %v574_v56 = vpop.f32.mrf.mxu3 }
  0xf5   : > { %v591_v57 = vadd.f32 %v564_v55, %v398_v51  ;;  %v595_v58 = vadd.f32 %v574_v56, %v402_v52  ;;  %v547_v59 = vpop.f32.mrf.mxu0  ;;  %v557_v60 = vpop.f32.mrf.mxu1 }
  0xf6   : > { %v584_v61 = vadd.f32 %v547_v59, %v391_v53  ;;  %v588_v62 = vadd.f32 %v557_v60, %v395_v54 }
  0xf7   : > { %607 = vst [vmem:[#allocation2 + $0x20] sm:$0xff] %v591_v57 }
  0xf8   : > { %611 = vst [vmem:[#allocation2 + $0x70] sm:$0xff] %v595_v58 }
  0xf9   : > { %600 = vst [vmem:[#allocation2 + $0x58] sm:$0xff] %v584_v61 }
  0xfa   : > { %604 = vst [vmem:[#allocation2 + $0x8] sm:$0xff] %v588_v62 }
  0xfc   : > { %v567_v3 = vpop.f32.mrf.mxu2  ;;  %v577_v4 = vpop.f32.mrf.mxu3 }
  0xfd   : > { %v592_v5 = vadd.f32 %v567_v3, %v399_v63  ;;  %v596_v6 = vadd.f32 %v577_v4, %v403_v0  ;;  %v549_v7 = vpop.f32.mrf.mxu0  ;;  %v559_v8 = vpop.f32.mrf.mxu1 }
  0xfe   : > { %v585_v9 = vadd.f32 %v549_v7, %v392_v1  ;;  %v589_v10 = vadd.f32 %v559_v8, %v396_v2 }
  0xff   : > { %608 = vst [vmem:[#allocation2 + $0x10] sm:$0xff] %v592_v5 }
 0x100   : > { %612 = vst [vmem:[#allocation2 + $0x78] sm:$0xff] %v596_v6 }
 0x101   : > { %601 = vst [vmem:[#allocation2 + $0x18] sm:$0xff] %v585_v9 }
 0x102   : > { %605 = vst [vmem:[#allocation2 + $0x48] sm:$0xff] %v589_v10 }
 0x104   : > { %v569_v13 = vpop.f32.mrf.mxu2  ;;  %v579_v14 = vpop.f32.mrf.mxu3  ;;  %617 = sbr.rel (%p986_p13) target bundleno = 459 (0x1cb), region = 89 }
 0x105   : > { %v593_v15 = vadd.f32 %v569_v13, %v400_v11  ;;  %v597_v16 = vadd.f32 %v579_v14, %v404_v12 }
 0x107   : > { %609 = vst [vmem:[#allocation2 + $0x38] sm:$0xff] %v593_v15 }
 0x108   : > { %613 = vst [vmem:[#allocation2 + $0x28] sm:$0xff] %v597_v16 }
 0x109   : > { %v721_v17 = vld [vmem:[%s1510_s4 + $0x78] sm:$0xff]  ;;  %v720_v18 = vld [vmem:[%s1510_s4 + $0x70] sm:$0xff]  ;;  %v719_v19 = vld [vmem:[%s1510_s4 + $0x68] sm:$0xff] }
 0x10a   : > { %722 = vmatpush.msra.mxu0 %v721_v17  ;;  %1077 = vmatpush.msra.mxu1 %v721_v17  ;;  %v718_v20 = vld [vmem:[%s1510_s4 + $0x60] sm:$0xff]  ;;  %v717_v21 = vld [vmem:[%s1510_s4 + $0x58] sm:$0xff]  ;;  %v716_v22 = vld [vmem:[%s1510_s4 + $0x50] sm:$0xff] }
 0x10b   : > { %1078 = vmatpush.msra.mxu2 %v721_v17  ;;  %1079 = vmatpush.msra.mxu3 %v721_v17  ;;  %v715_v23 = vld [vmem:[%s1510_s4 + $0x48] sm:$0xff]  ;;  %v714_v24 = vld [vmem:[%s1510_s4 + $0x40] sm:$0xff]  ;;  %v713_v25 = vld [vmem:[%s1510_s4 + $0x38] sm:$0xff] }
 0x10c   : > { %723 = vmatpush.msra.mxu0 %v720_v18  ;;  %1080 = vmatpush.msra.mxu1 %v720_v18  ;;  %v712_v26 = vld [vmem:[%s1510_s4 + $0x30] sm:$0xff]  ;;  %v711_v27 = vld [vmem:[%s1510_s4 + $0x28] sm:$0xff]  ;;  %v1420_v28 = vld [vmem:[%s1508_s2] ss:$0 sm:$0xff] }
 0x10d   : > { %1081 = vmatpush.msra.mxu2 %v720_v18  ;;  %1082 = vmatpush.msra.mxu3 %v720_v18  ;;  %v618_v29 = vld [vmem:[#allocation2 + $0x30] sm:$0xff]  ;;  %v626_v31 = vld [vmem:[#allocation2 + $0x40] sm:$0xff]  ;;  %v709_v34 = vld [vmem:[%s1510_s4 + $0x18] sm:$0xff] }
 0x10e   : > { %724 = vmatpush.msra.mxu0 %v719_v19  ;;  %1083 = vmatpush.msra.mxu1 %v719_v19  ;;  %v622_v30 = vld [vmem:[#allocation2 + $0x50] sm:$0xff]  ;;  %v710_v32 = vld [vmem:[%s1510_s4 + $0x20] sm:$0xff]  ;;  %v638_v35 = vadd.f32 %v1420_v28, %v618_v29  ;;  %v646_v38 = vadd.f32 %v1420_v28, %v626_v31  ;;  %v707_v41 = vld [vmem:[%s1510_s4 + $0x8] sm:$0xff] }
 0x10f   : > { %1084 = vmatpush.msra.mxu2 %v719_v19  ;;  %1085 = vmatpush.msra.mxu3 %v719_v19  ;;  %v630_v33 = vld [vmem:[#allocation2 + $0x60] sm:$0xff]  ;;  %v642_v37 = vadd.f32 %v1420_v28, %v622_v30  ;;  %v708_v40 = vld [vmem:[%s1510_s4 + $0x10] sm:$0xff]  ;;  %v623_v46 = vld [vmem:[#allocation2 + $0x68] sm:$0xff] }
 0x110   : > { %725 = vmatpush.msra.mxu0 %v718_v20  ;;  %1086 = vmatpush.msra.mxu1 %v718_v20  ;;  %v1432_v36 = vld [vmem:[%s1509_s3] ss:$0 sm:$0xff]  ;;  %v650_v39 = vadd.f32 %v1420_v28, %v630_v33  ;;  %vm654_vm0 = vcmp.ge.f32.partialorder %v638_v35, 0.0  ;;  %vm662_vm2 = vcmp.ge.f32.partialorder %v646_v38, 0.0  ;;  %v631_v50 = vld [vmem:[#allocation2 + $0x70] sm:$0xff]  ;;  %v643_v52 = vadd.f32 %v1420_v28, %v623_v46  ;;  %v620_v63 = vld [vmem:[#allocation2 + $0x58] sm:$0xff] }
 0x111   : > { %1087 = vmatpush.msra.mxu2 %v718_v20  ;;  %1088 = vmatpush.msra.mxu3 %v718_v20  ;;  %v674_v42 = vmul.f32 %v1432_v36, %v638_v35  ;;  %v678_v43 = vmul.f32 %v1432_v36, %v642_v37  ;;  %v682_v44 = vmul.f32 %v1432_v36, %v646_v38  ;;  %v619_v45 = vld [vmem:[#allocation2] sm:$0xff]  ;;  %vm658_vm1 = vcmp.ge.f32.partialorder %v642_v37, 0.0  ;;  %v624_v0 = vld [vmem:[#allocation2 + $0x8] sm:$0xff]  ;;  %v628_v1 = vld [vmem:[#allocation2 + $0x10] sm:$0xff] }
 0x112   : > { %726 = vmatpush.msra.mxu0 %v717_v21  ;;  %1089 = vmatpush.msra.mxu1 %v717_v21  ;;  %v686_v47 = vmul.f32 %v1432_v36, %v650_v39  ;;  %v706_v48 = vld [vmem:[%s1510_s4] sm:$0xff]  ;;  %vm666_vm3 = vcmp.ge.f32.partialorder %v650_v39, 0.0  ;;  %v639_v51 = vadd.f32 %v1420_v28, %v619_v45  ;;  %v651_v58 = vadd.f32 %v1420_v28, %v631_v50  ;;  %v632_v2 = vld [vmem:[#allocation2 + $0x78] sm:$0xff]  ;;  %v625_v16 = vld [vmem:[#allocation2 + $0x48] sm:$0xff] }
 0x113   : > { %1090 = vmatpush.msra.mxu2 %v717_v21  ;;  %1091 = vmatpush.msra.mxu3 %v717_v21  ;;  %v627_v49 = vld [vmem:[#allocation2 + $0x20] sm:$0xff]  ;;  %v690_v53 = vsel %vm654_vm0, %v638_v35, %v674_v42  ;;  %v694_v54 = vsel %vm658_vm1, %v642_v37, %v678_v43  ;;  %v698_v55 = vsel %vm662_vm2, %v646_v38, %v682_v44  ;;  %vm659_vm5 = vcmp.ge.f32.partialorder %v643_v52, 0.0  ;;  %v621_v15 = vld [vmem:[#allocation2 + $0x18] sm:$0xff]  ;;  %v633_v18 = vld [vmem:[#allocation2 + $0x28] sm:$0xff] }
 0x114   : > { %727 = vmatpush.msra.mxu0 %v716_v22  ;;  %1092 = vmatpush.msra.mxu1 %v716_v22  ;;  %v702_v56 = vsel %vm666_vm3, %v650_v39, %v686_v47  ;;  %v647_v57 = vadd.f32 %v1420_v28, %v627_v49  ;;  %v675_v59 = vmul.f32 %v1432_v36, %v639_v51  ;;  %vm655_vm4 = vcmp.ge.f32.partialorder %v639_v51, 0.0  ;;  %v629_v17 = vld [vmem:[#allocation2 + $0x38] sm:$0xff] }
 0x115   : > { %1093 = vmatpush.msra.mxu2 %v716_v22  ;;  %1094 = vmatpush.msra.mxu3 %v716_v22  ;;  %v679_v60 = vmul.f32 %v1432_v36, %v643_v52  ;;  %v687_v62 = vmul.f32 %v1432_v36, %v651_v58  ;;  %vm667_vm7 = vcmp.ge.f32.partialorder %v651_v58, 0.0  ;;  %v640_v5 = vadd.f32 %v1420_v28, %v620_v63 }
 0x116   : > { %728 = vmatpush.msra.mxu0 %v715_v23  ;;  %1095 = vmatpush.msra.mxu1 %v715_v23  ;;  %v683_v61 = vmul.f32 %v1432_v36, %v647_v57  ;;  %vm663_vm6 = vcmp.ge.f32.partialorder %v647_v57, 0.0  ;;  %v691_v3 = vsel %vm655_vm4, %v639_v51, %v675_v59  ;;  %v644_v6 = vadd.f32 %v1420_v28, %v624_v0 }
 0x117   : > { %1096 = vmatpush.msra.mxu2 %v715_v23  ;;  %1097 = vmatpush.msra.mxu3 %v715_v23  ;;  %v695_v4 = vsel %vm659_vm5, %v643_v52, %v679_v60  ;;  %v703_v8 = vsel %vm667_vm7, %v651_v58, %v687_v62  ;;  %v648_v9 = vadd.f32 %v1420_v28, %v628_v1  ;;  %vm656_vm8 = vcmp.ge.f32.partialorder %v640_v5, 0.0 }
 0x118   : > { %729 = vmatpush.msra.mxu0 %v714_v24  ;;  %1098 = vmatpush.msra.mxu1 %v714_v24  ;;  %v699_v7 = vsel %vm663_vm6, %v647_v57, %v683_v61  ;;  %v652_v10 = vadd.f32 %v1420_v28, %v632_v2  ;;  %v676_v11 = vmul.f32 %v1432_v36, %v640_v5  ;;  %vm660_vm9 = vcmp.ge.f32.partialorder %v644_v6, 0.0 }
 0x119   : > { %1099 = vmatpush.msra.mxu2 %v714_v24  ;;  %1100 = vmatpush.msra.mxu3 %v714_v24  ;;  %v680_v12 = vmul.f32 %v1432_v36, %v644_v6  ;;  %v684_v13 = vmul.f32 %v1432_v36, %v648_v9  ;;  %vm664_vm10 = vcmp.ge.f32.partialorder %v648_v9, 0.0  ;;  %v641_v21 = vadd.f32 %v1420_v28, %v621_v15 }
 0x11a   : > { %730 = vmatpush.msra.mxu0 %v713_v25  ;;  %1101 = vmatpush.msra.mxu1 %v713_v25  ;;  %v688_v14 = vmul.f32 %v1432_v36, %v652_v10  ;;  %vm668_vm11 = vcmp.ge.f32.partialorder %v652_v10, 0.0  ;;  %v692_v19 = vsel %vm656_vm8, %v640_v5, %v676_v11  ;;  %v645_v22 = vadd.f32 %v1420_v28, %v625_v16 }
 0x11b   : > { %1102 = vmatpush.msra.mxu2 %v713_v25  ;;  %1103 = vmatpush.msra.mxu3 %v713_v25  ;;  %v696_v20 = vsel %vm660_vm9, %v644_v6, %v680_v12  ;;  %v700_v23 = vsel %vm664_vm10, %v648_v9, %v684_v13  ;;  %v649_v25 = vadd.f32 %v1420_v28, %v629_v17  ;;  %vm657_vm12 = vcmp.ge.f32.partialorder %v641_v21, 0.0 }
 0x11c   : > { %731 = vmatpush.msra.mxu0 %v712_v26  ;;  %1104 = vmatpush.msra.mxu1 %v712_v26  ;;  %v704_v24 = vsel %vm668_vm11, %v652_v10, %v688_v14  ;;  %v681_v29 = vmul.f32 %v1432_v36, %v645_v22  ;;  %vm661_vm13 = vcmp.ge.f32.partialorder %v645_v22, 0.0 }
 0x11d   : > { %1105 = vmatpush.msra.mxu2 %v712_v26  ;;  %1106 = vmatpush.msra.mxu3 %v712_v26  ;;  %v653_v26 = vadd.f32 %v1420_v28, %v633_v18  ;;  %v685_v30 = vmul.f32 %v1432_v36, %v649_v25  ;;  %vm665_vm14 = vcmp.ge.f32.partialorder %v649_v25, 0.0 }
 0x11e   : > { %732 = vmatpush.msra.mxu0 %v711_v27  ;;  %1107 = vmatpush.msra.mxu1 %v711_v27  ;;  %v697_v33 = vsel %vm661_vm13, %v645_v22, %v681_v29 }
 0x11f   : > { %1108 = vmatpush.msra.mxu2 %v711_v27  ;;  %1109 = vmatpush.msra.mxu3 %v711_v27  ;;  %v677_v27 = vmul.f32 %v1432_v36, %v641_v21  ;;  %v689_v31 = vmul.f32 %v1432_v36, %v653_v26  ;;  %vm669_vm15 = vcmp.ge.f32.partialorder %v653_v26, 0.0  ;;  %v701_v28 = vsel %vm665_vm14, %v649_v25, %v685_v30 }
 0x120   : > { %733 = vmatpush.msra.mxu0 %v710_v32  ;;  %1110 = vmatpush.msra.mxu1 %v710_v32 }
 0x121   : > { %1111 = vmatpush.msra.mxu2 %v710_v32  ;;  %1112 = vmatpush.msra.mxu3 %v710_v32  ;;  %v693_v32 = vsel %vm657_vm12, %v641_v21, %v677_v27 }
 0x122   : > { %734 = vmatpush.msra.mxu0 %v709_v34  ;;  %1113 = vmatpush.msra.mxu1 %v709_v34 }
 0x123   : > { %1114 = vmatpush.msra.mxu2 %v709_v34  ;;  %1115 = vmatpush.msra.mxu3 %v709_v34  ;;  %v705_v34 = vsel %vm669_vm15, %v653_v26, %v689_v31 }
 0x124   : > { %735 = vmatpush.msra.mxu0 %v708_v40  ;;  %1116 = vmatpush.msra.mxu1 %v708_v40 }
 0x125   : > { %1117 = vmatpush.msra.mxu2 %v708_v40  ;;  %1118 = vmatpush.msra.mxu3 %v708_v40 }
 0x126   : > { %736 = vmatpush.msra.mxu0 %v707_v41  ;;  %1119 = vmatpush.msra.mxu1 %v707_v41 }
 0x127   : > { %1120 = vmatpush.msra.mxu2 %v707_v41  ;;  %1121 = vmatpush.msra.mxu3 %v707_v41 }
 0x128   : > { %737 = vmatpush.msra.mxu0 %v706_v48  ;;  %1122 = vmatpush.msra.mxu1 %v706_v48 }
 0x129   : > { %1123 = vmatpush.msra.mxu2 %v706_v48  ;;  %1124 = vmatpush.msra.mxu3 %v706_v48 }
 0x12a   : > { %738 = vmatmul.f32.vlgmr.msra.gmra.mxu0 %v690_v53  ;;  %750 = vmatmul.f32.vlgmr.msra.gmra.mxu1 %v694_v54 }
 0x12b   : > { %762 = vmatmul.f32.vlgmr.msra.gmra.mxu2 %v698_v55  ;;  %774 = vmatmul.f32.vlgmr.msra.gmra.mxu3 %v702_v56 }
 0x132   : > { %741 = vmatmul.f32.gmra.mxu0 %v691_v3  ;;  %753 = vmatmul.f32.gmra.mxu1 %v695_v4 }
 0x133   : > { %765 = vmatmul.f32.gmra.mxu2 %v699_v7  ;;  %777 = vmatmul.f32.gmra.mxu3 %v703_v8 }
 0x13a   : > { %744 = vmatmul.f32.gmra.mxu0 %v692_v19  ;;  %756 = vmatmul.f32.gmra.mxu1 %v696_v20 }
 0x13b   : > { %768 = vmatmul.f32.gmra.mxu2 %v700_v23  ;;  %780 = vmatmul.f32.gmra.mxu3 %v704_v24 }
 0x142   : > { %747 = vmatmul.f32.gmra.mxu0 %v693_v32  ;;  %759 = vmatmul.f32.gmra.mxu1 %v697_v33 }
 0x143   : > { %771 = vmatmul.f32.gmra.mxu2 %v701_v28  ;;  %783 = vmatmul.f32.gmra.mxu3 %v705_v34 }
 0x1a7   : > { %v739_v35 = vpop.f32.mrf.mxu0  ;;  %v751_v37 = vpop.f32.mrf.mxu1 }
 0x1ae   : > { %v763_v38 = vpop.f32.mrf.mxu2  ;;  %v775_v39 = vpop.f32.mrf.mxu3 }
 0x1af   : > { %v742_v40 = vpop.f32.mrf.mxu0  ;;  %v754_v36 = vpop.f32.mrf.mxu1 }
 0x1b0   : > { %v1009_v41 = vpack.c.bf16 %v742_v40, %v739_v35  ;;  %v1019_v42 = vpack.c.bf16 %v754_v36, %v751_v37 }
 0x1b2   : > { %1010 = vst [vmem:[%s1362_s12] sm:$0xff] %v1009_v41  }
 0x1b3   : > { %1047 = vst [vmem:[%s1362_s12 + $0x10] sm:$0xff] %v1019_v42  }
 0x1b6   : > { %v766_v43 = vpop.f32.mrf.mxu2  ;;  %v778_v44 = vpop.f32.mrf.mxu3 }
 0x1b7   : > { %v1029_v45 = vpack.c.bf16 %v766_v43, %v763_v38  ;;  %v1039_v46 = vpack.c.bf16 %v778_v44, %v775_v39  ;;  %v745_v47 = vpop.f32.mrf.mxu0  ;;  %v757_v48 = vpop.f32.mrf.mxu1 }
 0x1b9   : > { %1049 = vst [vmem:[%s1362_s12 + $0x20] sm:$0xff] %v1029_v45  }
 0x1ba   : > { %1051 = vst [vmem:[%s1362_s12 + $0x30] sm:$0xff] %v1039_v46  }
 0x1be   : > { %v769_v49 = vpop.f32.mrf.mxu2  ;;  %v781_v50 = vpop.f32.mrf.mxu3 }
 0x1bf   : > { %v748_v51 = vpop.f32.mrf.mxu0  ;;  %v760_v52 = vpop.f32.mrf.mxu1 }
 0x1c0   : > { %v1014_v53 = vpack.c.bf16 %v748_v51, %v745_v47  ;;  %v1024_v54 = vpack.c.bf16 %v760_v52, %v757_v48 }
 0x1c2   : > { %1046 = vst [vmem:[%s1362_s12 + $0x8] sm:$0xff] %v1014_v53  }
 0x1c3   : > { %1048 = vst [vmem:[%s1362_s12 + $0x18] sm:$0xff] %v1024_v54  }
 0x1c6   : > { %v772_v55 = vpop.f32.mrf.mxu2  ;;  %v784_v56 = vpop.f32.mrf.mxu3 }
 0x1c7   : > { %v1034_v57 = vpack.c.bf16 %v772_v55, %v769_v49  ;;  %v1044_v58 = vpack.c.bf16 %v784_v56, %v781_v50 }
 0x1c9   : > { %1050 = vst [vmem:[%s1362_s12 + $0x28] sm:$0xff] %v1034_v57  }
 0x1ca   : > { %1052 = vst [vmem:[%s1362_s12 + $0x38] sm:$0xff] %v1044_v58  }
 0x1cb PF: > { %s15_s24 = sadd.s32 1, %s1238_s24   ;;  %s1512_s18 = smov %s1218_s19 }
 0x1cc   : > { %p12_p0 = scmp.ge.s32.totalorder %s15_s24, 6   ;;  %s1513_s19 = smov %s1322_s6 }
 0x1cd   : > { %s1514_s20 = smov %s1230_s22  ;;  %s1515_s21 = smov %s1234_s23 }
 0x1ce   : > { %s1516_s22 = smov %s1519_s25  ;;  %s1517_s23 = smov %s1523_s26 }
 0x1cf   :  { %14 = sbr.rel (!%p12_p0) target bundleno = 4 (0x4), region = 127 }

// kernel: gcn_node_classif.5
= control target key start
LH: loop header
LB: loop body
LE: loop exit
PB: predicated region body
PF: predicated region fallthrough
CT: control target
= control target key end

     0   :  { %s1395_s27 = smov 0   ;;  %s1397_s28 = smov 0   ;;  %s1689_s0 = inlined_call_operand.vmem [shape: bf16[256,256], index: 0, kind: input, shape index: {}]   ;;  %s1690_s1 = inlined_call_operand.vmem [shape: bf16[256,128], index: 1, kind: input, shape index: {}]   ;;  %s1691_s2 = inlined_call_operand.vmem [shape: f32[1,128], index: 2, kind: input, shape index: {}]   ;;  %s1692_s3 = inlined_call_operand.vmem [shape: f32[1,128], index: 3, kind: input, shape index: {}]   ;;  %s1693_s4 = inlined_call_operand.vmem [shape: f32[128,128], index: 4, kind: input, shape index: {}]   ;;  %s1694_s5 = inlined_call_operand.vmem [shape: f32[1,128], index: 5, kind: input, shape index: {}]   ;;  %s1695_s6 = inlined_call_operand.vmem [shape: f32[128,128], index: 6, kind: input, shape index: {}]   ;;  %s1696_s7 = inlined_call_operand.vmem [shape: f32[1,128], index: 7, kind: input, shape index: {}]   ;;  %s1697_s8 = inlined_call_operand.vmem [shape: f32[256,128], index: 8, kind: output, shape index: {}]  }
   0x1   :  { %s1399_s29 = smov 0   ;;  %s1401_s30 = smov 0  }
   0x2   :  { %s1403_s9 = smov 0   ;;  %s1405_s10 = smov 0  }
   0x3   :  { %s1407_s11 = smov 0  }
   0x4 LB: > { %s27_s12 = sadd.s32 1, %s1339_s9  ;;  %s30_s13 = sadd.s32 1, %s1343_s10  ;;  %s1347_s11 = sphi %s1407_s11, %s18_s11   ;;  %s1343_s10 = sphi %s1405_s10, %s1703_s10   ;;  %s1339_s9 = sphi %s1403_s9, %s1702_s9   ;;  %s1335_s30 = sphi %s1401_s30, %s1701_s30   ;;  %s1331_s29 = sphi %s1399_s29, %s1700_s29   ;;  %s1327_s28 = sphi %s1397_s28, %s1699_s28   ;;  %s1323_s27 = sphi %s1395_s27, %s1698_s27  }
   0x5   : > { %p28_p0 = scmp.ge.s32.totalorder %s27_s12, 2  ;;  %p46_p1 = scmp.ne.s32.totalorder %s1327_s28, %s1323_s27 }
   0x6   : > { %p47_p2 = scmp.eq.s32.totalorder %s1347_s11, 0  ;;  %s39_s17 = sadd.s32 1, %s1327_s28 }
   0x7   : > { %s1705_s12 = smov (%p28_p0, %s27_s12), 0  ;;  %s1707_s13 = smov (!%p28_p0, %s30_s13), %s1343_s10 }
   0x8   : > { %p48_p3 = por %p47_p2, %p46_p1  ;;  %p32_p4 = scmp.ge.s32.totalorder %s1707_s13, 2 }
   0x9   : > { %s35_s14 = ssub.s32 %s1339_s9, %s1705_s12  ;;  %p1080_p6 = scmp.ge.s32.totalorder %s1347_s11, 4 }
   0xa   : > { %s1709_s13 = smov (%p32_p4, %s1707_s13), 0 }
   0xb   : > { %s34_s15 = ssub.s32 %s1343_s10, %s1709_s13  ;;  %268 = sbr.rel (%p1080_p6) target bundleno = 38 (0x26), region = 40 }
   0xc   : > { %s36_s16 = sor.u32 %s35_s14, %s34_s15 }
   0xd   : > { %p37_p5 = scmp.eq.s32.totalorder %s36_s16, 0 }
   0xf   : > { %s1446_s18 = scalar_select %p37_p5, %s1327_s28, %s39_s17  }
  0x10   : > { %271 = sbr.rel (!%p48_p3) target bundleno = 38 (0x26), region = 44  ;;  %s273_s19 = sand.u32 (%p48_p3), 1, %s1327_s28  }
  0x11   : > { %s1159_s20 = sshll.u32 (%p48_p3), %s1343_s10, 5  ;;  %s1081_s21 = sshll.u32 (%p48_p3), %s273_s19, 6 }
  0x12   : > { %s278_s22 = sadd.s32 (%p48_p3), %s1339_s9, %s1159_s20  ;;  %s275_s14 = scalar_lea.vmem (%p48_p3), [#allocation3], %s1081_s21 }
  0x13   : > { %s1084_s23 = sshll.u32 (%p48_p3), %s278_s22, 2 }
  0x14   : > { %s1455_s26 = scalar_lea.vmem (%p48_p3), %s1689_s0, %s1084_s23 }
  0x15   : > { %v297_v0 = vld [vmem:[%s1455_s26] sm:$0xf]  ;;  %v299_v1 = vld [vmem:[%s1455_s26 + $0x8] sm:$0xf]  ;;  %v301_v2 = vld [vmem:[%s1455_s26 + $0x10] sm:$0xf] }
  0x16   : > { %298 = vst [vmem:[%s275_s14] sm:$0xf] %v297_v0  ;;  %v303_v3 = vld [vmem:[%s1455_s26 + $0x18] sm:$0xf]  ;;  %v305_v4 = vld [vmem:[%s1455_s26 + $0x20] sm:$0xf] }
  0x17   : > { %300 = vst [vmem:[%s275_s14 + $0x4] sm:$0xf] %v299_v1  ;;  %v307_v5 = vld [vmem:[%s1455_s26 + $0x28] sm:$0xf]  ;;  %v309_v6 = vld [vmem:[%s1455_s26 + $0x30] sm:$0xf] }
  0x18   : > { %302 = vst [vmem:[%s275_s14 + $0x8] sm:$0xf] %v301_v2  ;;  %v311_v7 = vld [vmem:[%s1455_s26 + $0x38] sm:$0xf]  ;;  %v313_v8 = vld [vmem:[%s1455_s26 + $0x40] sm:$0xf] }
  0x19   : > { %304 = vst [vmem:[%s275_s14 + $0xc] sm:$0xf] %v303_v3  ;;  %v315_v9 = vld [vmem:[%s1455_s26 + $0x48] sm:$0xf]  ;;  %v317_v10 = vld [vmem:[%s1455_s26 + $0x50] sm:$0xf] }
  0x1a   : > { %306 = vst [vmem:[%s275_s14 + $0x10] sm:$0xf] %v305_v4  ;;  %v319_v11 = vld [vmem:[%s1455_s26 + $0x58] sm:$0xf]  ;;  %v321_v12 = vld [vmem:[%s1455_s26 + $0x60] sm:$0xf] }
  0x1b   : > { %308 = vst [vmem:[%s275_s14 + $0x14] sm:$0xf] %v307_v5  ;;  %v323_v13 = vld [vmem:[%s1455_s26 + $0x68] sm:$0xf]  ;;  %v325_v14 = vld [vmem:[%s1455_s26 + $0x70] sm:$0xf] }
  0x1c   : > { %310 = vst [vmem:[%s275_s14 + $0x18] sm:$0xf] %v309_v6  ;;  %v327_v15 = vld [vmem:[%s1455_s26 + $0x78] sm:$0xf] }
  0x1d   : > { %312 = vst [vmem:[%s275_s14 + $0x1c] sm:$0xf] %v311_v7 }
  0x1e   : > { %314 = vst [vmem:[%s275_s14 + $0x20] sm:$0xf] %v313_v8 }
  0x1f   : > { %316 = vst [vmem:[%s275_s14 + $0x24] sm:$0xf] %v315_v9 }
  0x20   : > { %318 = vst [vmem:[%s275_s14 + $0x28] sm:$0xf] %v317_v10 }
  0x21   : > { %320 = vst [vmem:[%s275_s14 + $0x2c] sm:$0xf] %v319_v11 }
  0x22   : > { %322 = vst [vmem:[%s275_s14 + $0x30] sm:$0xf] %v321_v12 }
  0x23   : > { %324 = vst [vmem:[%s275_s14 + $0x34] sm:$0xf] %v323_v13 }
  0x24   : > { %326 = vst [vmem:[%s275_s14 + $0x38] sm:$0xf] %v325_v14 }
  0x25   : > { %328 = vst [vmem:[%s275_s14 + $0x3c] sm:$0xf] %v327_v15 }
  0x26 PF: > { %p1085_p7 = scmp.ge.s32.totalorder %s1347_s11, 1  ;;  %p392_p8 = scmp.lt.s32.totalorder %s1347_s11, 5 }
  0x28   : > { %p393_p9 = pnand %p1085_p7, %p392_p8 }
  0x29   : > { %s399_s15 = sand.u32 (!%p393_p9), 1, %s1323_s27   ;;  %s1087_s16 = sshll.u32 (!%p393_p9), %s1331_s29, 4 }
  0x2a   : > { %396 = sbr.rel (%p393_p9) target bundleno = 624 (0x270), region = 89  ;;  %s1086_s17 = sshll.u32 (!%p393_p9), %s399_s15, 6 }
  0x2b   : > { %p439_p10 = scmp.lt.s32.totalorder (!%p393_p9), %s1087_s16, 31  ;;  %s1089_s19 = sshll.u32 (!%p393_p9), %s1335_s30, 4 }
  0x2c   : > { %p445_p11 = scmp.lt.s32.totalorder (!%p393_p9), %s1089_s19, 31  ;;  %s1488_s27 = scalar_lea.vmem (!%p393_p9), [#allocation3], %s1086_s17 }
  0x2d   : > { %p1091_p12 = scmp.ne.s32.totalorder (!%p393_p9), %s1331_s29, 0 }
  0x2f   : > { %s1711_s16 = smov (!%p439_p10, %s1087_s16), 31  ;;  %s1713_s19 = smov (!%p445_p11, %s1089_s19), 31 }
  0x30   : > { %s1088_s20 = sshll.u32 %s1711_s16, 2  ;;  %s1090_s24 = sshll.u32 %s1713_s19, 3 }
  0x31   : > { %s1481_s23 = scalar_lea.vmem %s1690_s1, %s1088_s20  ;;  %s1486_s14 = scalar_lea.vmem %s1697_s8, %s1090_s24 }
  0x32   : > { %453 = sbr.rel (%p1091_p12) target bundleno = 72 (0x48), region = 97 }
  0x37   : > { %v1349_v16 = vmov 0.0  }
  0x38   : > { %454 = vst [vmem:[#allocation2 + $0x30] sm:$0xff] %v1349_v16 }
  0x39   : > { %455 = vst [vmem:[#allocation2] sm:$0xff] %v1349_v16 }
  0x3a   : > { %456 = vst [vmem:[#allocation2 + $0x58] sm:$0xff] %v1349_v16 }
  0x3b   : > { %457 = vst [vmem:[#allocation2 + $0x18] sm:$0xff] %v1349_v16 }
  0x3c   : > { %458 = vst [vmem:[#allocation2 + $0x50] sm:$0xff] %v1349_v16 }
  0x3d   : > { %459 = vst [vmem:[#allocation2 + $0x68] sm:$0xff] %v1349_v16 }
  0x3e   : > { %460 = vst [vmem:[#allocation2 + $0x8] sm:$0xff] %v1349_v16 }
  0x3f   : > { %461 = vst [vmem:[#allocation2 + $0x48] sm:$0xff] %v1349_v16 }
  0x40   : > { %462 = vst [vmem:[#allocation2 + $0x40] sm:$0xff] %v1349_v16 }
  0x41   : > { %463 = vst [vmem:[#allocation2 + $0x20] sm:$0xff] %v1349_v16 }
  0x42   : > { %464 = vst [vmem:[#allocation2 + $0x10] sm:$0xff] %v1349_v16 }
  0x43   : > { %465 = vst [vmem:[#allocation2 + $0x38] sm:$0xff] %v1349_v16 }
  0x44   : > { %466 = vst [vmem:[#allocation2 + $0x60] sm:$0xff] %v1349_v16 }
  0x45   : > { %467 = vst [vmem:[#allocation2 + $0x70] sm:$0xff] %v1349_v16 }
  0x46   : > { %468 = vst [vmem:[#allocation2 + $0x78] sm:$0xff] %v1349_v16 }
  0x47   : > { %469 = vst [vmem:[#allocation2 + $0x28] sm:$0xff] %v1349_v16 }
  0x48 PF: > { %v1175_v17 = vld [vmem:[%s1481_s23 + $0x38] sm:$0xff]  ;;  %v1174_v18 = vld [vmem:[%s1481_s23 + $0x30] sm:$0xff]  ;;  %v1173_v19 = vld [vmem:[%s1481_s23 + $0x28] sm:$0xff]  ;;  %p1156_p13 = scmp.ne.s32.totalorder %s1331_s29, 1 }
  0x49   : > { %614 = vmatpush.bf16.msra.mxu0 %v1175_v17  ;;  %1176 = vmatpush.bf16.msra.mxu1 %v1175_v17  ;;  %v1172_v20 = vld [vmem:[%s1481_s23 + $0x20] sm:$0xff]  ;;  %v1171_v21 = vld [vmem:[%s1481_s23 + $0x18] sm:$0xff]  ;;  %v1170_v22 = vld [vmem:[%s1481_s23 + $0x10] sm:$0xff] }
  0x4a   : > { %1177 = vmatpush.bf16.msra.mxu2 %v1175_v17  ;;  %1178 = vmatpush.bf16.msra.mxu3 %v1175_v17  ;;  %v1169_v23 = vld [vmem:[%s1481_s23 + $0x8] sm:$0xff]  ;;  %v1168_v24 = vld [vmem:[%s1481_s23] sm:$0xff]  ;;  %v1162_v26 = vld [vmem:[%s1488_s27 + $0x10] sm:$0xff] }
  0x4b   : > { %v1160_v25 = vld [vmem:[%s1488_s27] sm:$0xff]  ;;  %v1166_v28 = vld [vmem:[%s1488_s27 + $0x30] sm:$0xff]  ;;  %v1161_v29 = vld [vmem:[%s1488_s27 + $0x8] sm:$0xff] }
  0x4c   : > { %v1164_v27 = vld [vmem:[%s1488_s27 + $0x20] sm:$0xff]  ;;  %v1163_v30 = vld [vmem:[%s1488_s27 + $0x18] sm:$0xff]  ;;  %v1165_v31 = vld [vmem:[%s1488_s27 + $0x28] sm:$0xff] }
  0x4d   : > { %615 = vmatpush.bf16.msra.mxu0 %v1174_v18  ;;  %1179 = vmatpush.bf16.msra.mxu1 %v1174_v18  ;;  %v1167_v32 = vld [vmem:[%s1488_s27 + $0x38] sm:$0xff]  ;;  %v470_v33 = vld [vmem:[#allocation2 + $0x30] sm:$0xff]  ;;  %v478_v39 = vld [vmem:[#allocation2 + $0x40] sm:$0xff] }
  0x4e   : > { %1180 = vmatpush.bf16.msra.mxu2 %v1174_v18  ;;  %1181 = vmatpush.bf16.msra.mxu3 %v1174_v18  ;;  %v474_v34 = vld [vmem:[#allocation2 + $0x50] sm:$0xff]  ;;  %v482_v40 = vld [vmem:[#allocation2 + $0x60] sm:$0xff]  ;;  %v475_v42 = vld [vmem:[#allocation2 + $0x68] sm:$0xff] }
  0x4f   : > { %v471_v41 = vld [vmem:[#allocation2] sm:$0xff]  ;;  %v483_v52 = vld [vmem:[#allocation2 + $0x70] sm:$0xff]  ;;  %v472_v53 = vld [vmem:[#allocation2 + $0x58] sm:$0xff] }
  0x50   : > { %v479_v51 = vld [vmem:[#allocation2 + $0x20] sm:$0xff]  ;;  %v476_v54 = vld [vmem:[#allocation2 + $0x8] sm:$0xff]  ;;  %v480_v63 = vld [vmem:[#allocation2 + $0x10] sm:$0xff] }
  0x51   : > { %616 = vmatpush.bf16.msra.mxu0 %v1173_v19  ;;  %1182 = vmatpush.bf16.msra.mxu1 %v1173_v19  ;;  %v484_v0 = vld [vmem:[#allocation2 + $0x78] sm:$0xff]  ;;  %v477_v2 = vld [vmem:[#allocation2 + $0x48] sm:$0xff] }
  0x52   : > { %1183 = vmatpush.bf16.msra.mxu2 %v1173_v19  ;;  %1184 = vmatpush.bf16.msra.mxu3 %v1173_v19  ;;  %v473_v1 = vld [vmem:[#allocation2 + $0x18] sm:$0xff]  ;;  %v485_v12 = vld [vmem:[#allocation2 + $0x28] sm:$0xff] }
  0x53   : > { %v481_v11 = vld [vmem:[#allocation2 + $0x38] sm:$0xff] }
  0x55   : > { %617 = vmatpush.bf16.msra.mxu0 %v1172_v20  ;;  %1185 = vmatpush.bf16.msra.mxu1 %v1172_v20 }
  0x56   : > { %1186 = vmatpush.bf16.msra.mxu2 %v1172_v20  ;;  %1187 = vmatpush.bf16.msra.mxu3 %v1172_v20 }
  0x59   : > { %618 = vmatpush.bf16.msra.mxu0 %v1171_v21  ;;  %1188 = vmatpush.bf16.msra.mxu1 %v1171_v21 }
  0x5a   : > { %1189 = vmatpush.bf16.msra.mxu2 %v1171_v21  ;;  %1190 = vmatpush.bf16.msra.mxu3 %v1171_v21 }
  0x5d   : > { %619 = vmatpush.bf16.msra.mxu0 %v1170_v22  ;;  %1191 = vmatpush.bf16.msra.mxu1 %v1170_v22 }
  0x5e   : > { %1192 = vmatpush.bf16.msra.mxu2 %v1170_v22  ;;  %1193 = vmatpush.bf16.msra.mxu3 %v1170_v22 }
  0x61   : > { %620 = vmatpush.bf16.msra.mxu0 %v1169_v23  ;;  %1194 = vmatpush.bf16.msra.mxu1 %v1169_v23 }
  0x62   : > { %1195 = vmatpush.bf16.msra.mxu2 %v1169_v23  ;;  %1196 = vmatpush.bf16.msra.mxu3 %v1169_v23 }
  0x65   : > { %621 = vmatpush.bf16.msra.mxu0 %v1168_v24  ;;  %1197 = vmatpush.bf16.msra.mxu1 %v1168_v24 }
  0x66   : > { %1198 = vmatpush.bf16.msra.mxu2 %v1168_v24  ;;  %1199 = vmatpush.bf16.msra.mxu3 %v1168_v24 }
  0x68   : > { %622 = vmatmul.bf16.vlgmr.msra.gmra.mxu0 %v1160_v25  ;;  %632 = vmatmul.bf16.vlgmr.msra.gmra.mxu1 %v1162_v26 }
  0x69   : > { %642 = vmatmul.bf16.vlgmr.msra.gmra.mxu2 %v1164_v27  ;;  %652 = vmatmul.bf16.vlgmr.msra.gmra.mxu3 %v1166_v28 }
  0x78   : > { %627 = vmatmul.bf16.gmra.mxu0 %v1161_v29  ;;  %637 = vmatmul.bf16.gmra.mxu1 %v1163_v30 }
  0x79   : > { %647 = vmatmul.bf16.gmra.mxu2 %v1165_v31  ;;  %657 = vmatmul.bf16.gmra.mxu3 %v1167_v32 }
  0xe5   : > { %v623_v35 = vpop.f32.mrf.mxu0  ;;  %v633_v36 = vpop.f32.mrf.mxu1 }
  0xe6   : > { %v663_v37 = vadd.f32 %v623_v35, %v470_v33  ;;  %v667_v38 = vadd.f32 %v633_v36, %v474_v34 }
  0xe8   : > { %679 = vst [vmem:[#allocation2 + $0x30] sm:$0xff] %v663_v37 }
  0xe9   : > { %683 = vst [vmem:[#allocation2 + $0x50] sm:$0xff] %v667_v38 }
  0xec   : > { %v643_v43 = vpop.f32.mrf.mxu2  ;;  %v653_v44 = vpop.f32.mrf.mxu3 }
  0xed   : > { %v671_v45 = vadd.f32 %v643_v43, %v478_v39  ;;  %v675_v46 = vadd.f32 %v653_v44, %v482_v40  ;;  %v625_v47 = vpop.f32.mrf.mxu0  ;;  %v635_v48 = vpop.f32.mrf.mxu1 }
  0xee   : > { %v664_v49 = vadd.f32 %v625_v47, %v471_v41  ;;  %v668_v50 = vadd.f32 %v635_v48, %v475_v42 }
  0xef   : > { %687 = vst [vmem:[#allocation2 + $0x40] sm:$0xff] %v671_v45 }
  0xf0   : > { %691 = vst [vmem:[#allocation2 + $0x60] sm:$0xff] %v675_v46 }
  0xf1   : > { %680 = vst [vmem:[#allocation2] sm:$0xff] %v664_v49 }
  0xf2   : > { %684 = vst [vmem:[#allocation2 + $0x68] sm:$0xff] %v668_v50 }
  0xf4   : > { %v645_v55 = vpop.f32.mrf.mxu2  ;;  %v655_v56 = vpop.f32.mrf.mxu3 }
  0xf5   : > { %v672_v57 = vadd.f32 %v645_v55, %v479_v51  ;;  %v676_v58 = vadd.f32 %v655_v56, %v483_v52  ;;  %v628_v59 = vpop.f32.mrf.mxu0  ;;  %v638_v60 = vpop.f32.mrf.mxu1 }
  0xf6   : > { %v665_v61 = vadd.f32 %v628_v59, %v472_v53  ;;  %v669_v62 = vadd.f32 %v638_v60, %v476_v54 }
  0xf7   : > { %688 = vst [vmem:[#allocation2 + $0x20] sm:$0xff] %v672_v57 }
  0xf8   : > { %692 = vst [vmem:[#allocation2 + $0x70] sm:$0xff] %v676_v58 }
  0xf9   : > { %681 = vst [vmem:[#allocation2 + $0x58] sm:$0xff] %v665_v61 }
  0xfa   : > { %685 = vst [vmem:[#allocation2 + $0x8] sm:$0xff] %v669_v62 }
  0xfc   : > { %v648_v3 = vpop.f32.mrf.mxu2  ;;  %v658_v4 = vpop.f32.mrf.mxu3 }
  0xfd   : > { %v673_v5 = vadd.f32 %v648_v3, %v480_v63  ;;  %v677_v6 = vadd.f32 %v658_v4, %v484_v0  ;;  %v630_v7 = vpop.f32.mrf.mxu0  ;;  %v640_v8 = vpop.f32.mrf.mxu1 }
  0xfe   : > { %v666_v9 = vadd.f32 %v630_v7, %v473_v1  ;;  %v670_v10 = vadd.f32 %v640_v8, %v477_v2 }
  0xff   : > { %689 = vst [vmem:[#allocation2 + $0x10] sm:$0xff] %v673_v5 }
 0x100   : > { %693 = vst [vmem:[#allocation2 + $0x78] sm:$0xff] %v677_v6 }
 0x101   : > { %682 = vst [vmem:[#allocation2 + $0x18] sm:$0xff] %v666_v9 }
 0x102   : > { %686 = vst [vmem:[#allocation2 + $0x48] sm:$0xff] %v670_v10 }
 0x104   : > { %v650_v13 = vpop.f32.mrf.mxu2  ;;  %v660_v14 = vpop.f32.mrf.mxu3  ;;  %698 = sbr.rel (%p1156_p13) target bundleno = 624 (0x270), region = 101 }
 0x105   : > { %v674_v15 = vadd.f32 %v650_v13, %v481_v11  ;;  %v678_v16 = vadd.f32 %v660_v14, %v485_v12 }
 0x107   : > { %690 = vst [vmem:[#allocation2 + $0x38] sm:$0xff] %v674_v15 }
 0x108   : > { %694 = vst [vmem:[#allocation2 + $0x28] sm:$0xff] %v678_v16 }
 0x109   : > { %v802_v17 = vld [vmem:[%s1693_s4 + $0x78] sm:$0xff]  ;;  %v801_v18 = vld [vmem:[%s1693_s4 + $0x70] sm:$0xff]  ;;  %v800_v19 = vld [vmem:[%s1693_s4 + $0x68] sm:$0xff] }
 0x10a   : > { %1200 = vmatpush.msra.mxu2 %v802_v17  ;;  %807 = vmatpush.msra.mxu0 %v802_v17  ;;  %v799_v20 = vld [vmem:[%s1693_s4 + $0x60] sm:$0xff]  ;;  %v798_v21 = vld [vmem:[%s1693_s4 + $0x58] sm:$0xff]  ;;  %v797_v22 = vld [vmem:[%s1693_s4 + $0x50] sm:$0xff] }
 0x10b   : > { %v796_v23 = vld [vmem:[%s1693_s4 + $0x48] sm:$0xff]  ;;  %v795_v24 = vld [vmem:[%s1693_s4 + $0x40] sm:$0xff]  ;;  %v794_v25 = vld [vmem:[%s1693_s4 + $0x38] sm:$0xff] }
 0x10c   : > { %1201 = vmatpush.msra.mxu2 %v801_v18  ;;  %808 = vmatpush.msra.mxu0 %v801_v18  ;;  %v793_v26 = vld [vmem:[%s1693_s4 + $0x30] sm:$0xff]  ;;  %v1541_v27 = vld [vmem:[%s1691_s2] ss:$0 sm:$0xff]  ;;  %v792_v28 = vld [vmem:[%s1693_s4 + $0x28] sm:$0xff] }
 0x10d   : > { %v707_v29 = vld [vmem:[#allocation2 + $0x40] sm:$0xff]  ;;  %v699_v30 = vld [vmem:[#allocation2 + $0x30] sm:$0xff]  ;;  %v790_v35 = vld [vmem:[%s1693_s4 + $0x18] sm:$0xff] }
 0x10e   : > { %1202 = vmatpush.msra.mxu2 %v800_v19  ;;  %809 = vmatpush.msra.mxu0 %v800_v19  ;;  %v791_v31 = vld [vmem:[%s1693_s4 + $0x20] sm:$0xff]  ;;  %v727_v32 = vadd.f32 %v1541_v27, %v707_v29  ;;  %v719_v34 = vadd.f32 %v1541_v27, %v699_v30  ;;  %v789_v36 = vld [vmem:[%s1693_s4 + $0x10] sm:$0xff]  ;;  %v788_v40 = vld [vmem:[%s1693_s4 + $0x8] sm:$0xff] }
 0x10f   : > { %v1553_v33 = vld [vmem:[%s1692_s3] ss:$0 sm:$0xff]  ;;  %v709_v49 = vld [vmem:[#allocation2 + $0x10] sm:$0xff]  ;;  %v701_v50 = vld [vmem:[#allocation2 + $0x58] sm:$0xff] }
 0x110   : > { %1203 = vmatpush.msra.mxu2 %v799_v20  ;;  %810 = vmatpush.msra.mxu0 %v799_v20  ;;  %v763_v37 = vmul.f32 %v1553_v33, %v727_v32  ;;  %v708_v38 = vld [vmem:[#allocation2 + $0x20] sm:$0xff]  ;;  %v755_v39 = vmul.f32 %v1553_v33, %v719_v34  ;;  %vm743_vm0 = vcmp.ge.f32.partialorder %v727_v32, 0.0  ;;  %vm735_vm1 = vcmp.ge.f32.partialorder %v719_v34, 0.0  ;;  %v710_v57 = vld [vmem:[#allocation2 + $0x38] sm:$0xff]  ;;  %v703_v2 = vld [vmem:[#allocation2 + $0x50] sm:$0xff] }
 0x111   : > { %v700_v41 = vld [vmem:[#allocation2] sm:$0xff]  ;;  %v728_v43 = vadd.f32 %v1541_v27, %v708_v38  ;;  %v729_v52 = vadd.f32 %v1541_v27, %v709_v49  ;;  %v721_v54 = vadd.f32 %v1541_v27, %v701_v50  ;;  %v702_v58 = vld [vmem:[#allocation2 + $0x18] sm:$0xff]  ;;  %v730_v60 = vadd.f32 %v1541_v27, %v710_v57  ;;  %v902_v9 = vld [vmem:[%s1695_s6 + $0x70] sm:$0xff] }
 0x112   : > { %1204 = vmatpush.msra.mxu2 %v798_v21  ;;  %811 = vmatpush.msra.mxu0 %v798_v21  ;;  %v787_v42 = vld [vmem:[%s1693_s4] sm:$0xff]  ;;  %v779_v44 = vsel %vm743_vm0, %v727_v32, %v763_v37  ;;  %v771_v45 = vsel %vm735_vm1, %v719_v34, %v755_v39  ;;  %v720_v46 = vadd.f32 %v1541_v27, %v700_v41  ;;  %v903_v8 = vld [vmem:[%s1695_s6 + $0x78] sm:$0xff]  ;;  %v712_v11 = vld [vmem:[#allocation2 + $0x70] sm:$0xff] }
 0x113   : > { %v764_v47 = vmul.f32 %v1553_v33, %v728_v43  ;;  %vm744_vm2 = vcmp.ge.f32.partialorder %v728_v43, 0.0  ;;  %v765_v55 = vmul.f32 %v1553_v33, %v729_v52  ;;  %v757_v56 = vmul.f32 %v1553_v33, %v721_v54  ;;  %v711_v0 = vld [vmem:[#allocation2 + $0x60] sm:$0xff]  ;;  %1216 = vmatpush.msra.mxu3 %v903_v8  ;;  %908 = vmatpush.msra.mxu1 %v903_v8  ;;  %v704_v12 = vld [vmem:[#allocation2 + $0x68] sm:$0xff]  ;;  %v899_v19 = vld [vmem:[%s1695_s6 + $0x58] sm:$0xff] }
 0x114   : > { %1205 = vmatpush.msra.mxu2 %v797_v22  ;;  %812 = vmatpush.msra.mxu0 %v797_v22  ;;  %v756_v48 = vmul.f32 %v1553_v33, %v720_v46  ;;  %vm736_vm3 = vcmp.ge.f32.partialorder %v720_v46, 0.0  ;;  %vm745_vm4 = vcmp.ge.f32.partialorder %v729_v52, 0.0  ;;  %vm737_vm5 = vcmp.ge.f32.partialorder %v721_v54, 0.0  ;;  %v901_v13 = vld [vmem:[%s1695_s6 + $0x68] sm:$0xff]  ;;  %v900_v15 = vld [vmem:[%s1695_s6 + $0x60] sm:$0xff]  ;;  %v898_v20 = vld [vmem:[%s1695_s6 + $0x50] sm:$0xff] }
 0x115   : > { %v780_v51 = vsel %vm744_vm2, %v728_v43, %v764_v47  ;;  %v781_v59 = vsel %vm745_vm4, %v729_v52, %v765_v55  ;;  %v773_v61 = vsel %vm737_vm5, %v721_v54, %v757_v56  ;;  %v722_v62 = vadd.f32 %v1541_v27, %v702_v58  ;;  %1217 = vmatpush.msra.mxu3 %v902_v9  ;;  %v713_v22 = vld [vmem:[#allocation2 + $0x78] sm:$0xff]  ;;  %v714_v37 = vld [vmem:[#allocation2 + $0x28] sm:$0xff]  ;;  %v892_v41 = vld [vmem:[%s1695_s6 + $0x20] sm:$0xff] }
 0x116   : > { %1206 = vmatpush.msra.mxu2 %v796_v23  ;;  %813 = vmatpush.msra.mxu0 %v796_v23  ;;  %v772_v53 = vsel %vm736_vm3, %v720_v46, %v756_v48  ;;  %v766_v63 = vmul.f32 %v1553_v33, %v730_v60  ;;  %vm746_vm6 = vcmp.ge.f32.partialorder %v730_v60, 0.0  ;;  %v731_v3 = vadd.f32 %v1541_v27, %v711_v0  ;;  %v895_v32 = vld [vmem:[%s1695_s6 + $0x38] sm:$0xff]  ;;  %v706_v38 = vld [vmem:[#allocation2 + $0x48] sm:$0xff]  ;;  %v890_v49 = vld [vmem:[%s1695_s6 + $0x10] sm:$0xff] }
 0x117   : > { %v758_v1 = vmul.f32 %v1553_v33, %v722_v62  ;;  %vm738_vm7 = vcmp.ge.f32.partialorder %v722_v62, 0.0  ;;  %v723_v6 = vadd.f32 %v1541_v27, %v703_v2  ;;  %909 = vmatpush.msra.mxu1 %v902_v9  ;;  %v732_v16 = vadd.f32 %v1541_v27, %v712_v11  ;;  %1218 = vmatpush.msra.mxu3 %v901_v13  ;;  %v893_v39 = vld [vmem:[%s1695_s6 + $0x28] sm:$0xff] }
 0x118   : > { %1207 = vmatpush.msra.mxu2 %v795_v24  ;;  %814 = vmatpush.msra.mxu0 %v795_v24  ;;  %v782_v4 = vsel %vm746_vm6, %v730_v60, %v766_v63  ;;  %v767_v7 = vmul.f32 %v1553_v33, %v731_v3  ;;  %vm747_vm8 = vcmp.ge.f32.partialorder %v731_v3, 0.0  ;;  %v724_v18 = vadd.f32 %v1541_v27, %v704_v12  ;;  %v705_v24 = vld [vmem:[#allocation2 + $0x8] sm:$0xff] }
 0x119   : > { %v774_v5 = vsel %vm738_vm7, %v722_v62, %v758_v1  ;;  %v759_v10 = vmul.f32 %v1553_v33, %v723_v6  ;;  %vm739_vm9 = vcmp.ge.f32.partialorder %v723_v6, 0.0  ;;  %910 = vmatpush.msra.mxu1 %v901_v13  ;;  %1219 = vmatpush.msra.mxu3 %v900_v15  ;;  %v768_v21 = vmul.f32 %v1553_v33, %v732_v16  ;;  %v889_v50 = vld [vmem:[%s1695_s6 + $0x8] sm:$0xff] }
 0x11a   : > { %1208 = vmatpush.msra.mxu2 %v794_v25  ;;  %815 = vmatpush.msra.mxu0 %v794_v25  ;;  %v783_v14 = vsel %vm747_vm8, %v731_v3, %v767_v7  ;;  %v760_v23 = vmul.f32 %v1553_v33, %v724_v18  ;;  %vm748_vm10 = vcmp.ge.f32.partialorder %v732_v16, 0.0  ;;  %vm740_vm11 = vcmp.ge.f32.partialorder %v724_v18, 0.0  ;;  %v897_v25 = vld [vmem:[%s1695_s6 + $0x48] sm:$0xff] }
 0x11b   : > { %v775_v17 = vsel %vm739_vm9, %v723_v6, %v759_v10  ;;  %911 = vmatpush.msra.mxu1 %v900_v15  ;;  %1220 = vmatpush.msra.mxu3 %v899_v19  ;;  %v784_v29 = vsel %vm748_vm10, %v732_v16, %v768_v21 }
 0x11c   : > { %1209 = vmatpush.msra.mxu2 %v793_v26  ;;  %816 = vmatpush.msra.mxu0 %v793_v26  ;;  %v733_v26 = vadd.f32 %v1541_v27, %v713_v22  ;;  %v776_v30 = vsel %vm740_vm11, %v724_v18, %v760_v23 }
 0x11d   : > { %912 = vmatpush.msra.mxu1 %v899_v19  ;;  %1221 = vmatpush.msra.mxu3 %v898_v20 }
 0x11e   : > { %1210 = vmatpush.msra.mxu2 %v792_v28  ;;  %817 = vmatpush.msra.mxu0 %v792_v28  ;;  %v896_v28 = vld [vmem:[%s1695_s6 + $0x40] sm:$0xff]  ;;  %v769_v34 = vmul.f32 %v1553_v33, %v733_v26  ;;  %vm749_vm12 = vcmp.ge.f32.partialorder %v733_v26, 0.0 }
 0x11f   : > { %913 = vmatpush.msra.mxu1 %v898_v20  ;;  %1222 = vmatpush.msra.mxu3 %v897_v25 }
 0x120   : > { %1211 = vmatpush.msra.mxu2 %v791_v31  ;;  %818 = vmatpush.msra.mxu0 %v791_v31  ;;  %v725_v31 = vadd.f32 %v1541_v27, %v705_v24 }
 0x121   : > { %914 = vmatpush.msra.mxu1 %v897_v25  ;;  %1223 = vmatpush.msra.mxu3 %v896_v28 }
 0x122   : > { %1212 = vmatpush.msra.mxu2 %v790_v35  ;;  %819 = vmatpush.msra.mxu0 %v790_v35  ;;  %v894_v35 = vld [vmem:[%s1695_s6 + $0x30] sm:$0xff]  ;;  %vm741_vm13 = vcmp.ge.f32.partialorder %v725_v31, 0.0 }
 0x123   : > { %915 = vmatpush.msra.mxu1 %v896_v28  ;;  %1224 = vmatpush.msra.mxu3 %v895_v32 }
 0x124   : > { %1213 = vmatpush.msra.mxu2 %v789_v36  ;;  %820 = vmatpush.msra.mxu0 %v789_v36  ;;  %v761_v36 = vmul.f32 %v1553_v33, %v725_v31 }
 0x125   : > { %916 = vmatpush.msra.mxu1 %v895_v32  ;;  %1225 = vmatpush.msra.mxu3 %v894_v35 }
 0x126   : > { %1214 = vmatpush.msra.mxu2 %v788_v40  ;;  %821 = vmatpush.msra.mxu0 %v788_v40  ;;  %v785_v40 = vsel %vm749_vm12, %v733_v26, %v769_v34  ;;  %v777_v43 = vsel %vm741_vm13, %v725_v31, %v761_v36 }
 0x127   : > { %917 = vmatpush.msra.mxu1 %v894_v35  ;;  %1226 = vmatpush.msra.mxu3 %v893_v39 }
 0x128   : > { %1215 = vmatpush.msra.mxu2 %v787_v42  ;;  %822 = vmatpush.msra.mxu0 %v787_v42  ;;  %v734_v42 = vadd.f32 %v1541_v27, %v714_v37 }
 0x129   : > { %847 = vmatmul.f32.vlgmr.msra.gmra.mxu2 %v779_v44  ;;  %823 = vmatmul.f32.vlgmr.msra.gmra.mxu0 %v771_v45  ;;  %v726_v44 = vadd.f32 %v1541_v27, %v706_v38  ;;  %v891_v45 = vld [vmem:[%s1695_s6 + $0x18] sm:$0xff]  ;;  %v1292_v38 = vld [vmem:[%s1696_s7] ss:$0 sm:$0xff] }
 0x12a   : > { %918 = vmatpush.msra.mxu1 %v893_v39  ;;  %1227 = vmatpush.msra.mxu3 %v892_v41  ;;  %v770_v46 = vmul.f32 %v1553_v33, %v734_v42  ;;  %vm750_vm14 = vcmp.ge.f32.partialorder %v734_v42, 0.0 }
 0x12b   : > { %v762_v47 = vmul.f32 %v1553_v33, %v726_v44  ;;  %vm742_vm15 = vcmp.ge.f32.partialorder %v726_v44, 0.0  ;;  %v888_v33 = vld [vmem:[%s1695_s6] sm:$0xff] }
 0x12c   : > { %919 = vmatpush.msra.mxu1 %v892_v41  ;;  %1228 = vmatpush.msra.mxu3 %v891_v45  ;;  %v786_v48 = vsel %vm750_vm14, %v734_v42, %v770_v46 }
 0x12d   : > { %v778_v27 = vsel %vm742_vm15, %v726_v44, %v762_v47 }
 0x12e   : > { %920 = vmatpush.msra.mxu1 %v891_v45  ;;  %1229 = vmatpush.msra.mxu3 %v890_v49 }
 0x130   : > { %921 = vmatpush.msra.mxu1 %v890_v49  ;;  %1230 = vmatpush.msra.mxu3 %v889_v50 }
 0x131   : > { %850 = vmatmul.f32.gmra.mxu2 %v780_v51  ;;  %826 = vmatmul.f32.gmra.mxu0 %v772_v53  ;;  %v1291_v51 = vld [vmem:[%s1694_s5] ss:$0 sm:$0xff] }
 0x132   : > { %922 = vmatpush.msra.mxu1 %v889_v50  ;;  %1231 = vmatpush.msra.mxu3 %v888_v33 }
 0x134   : > { %923 = vmatpush.msra.mxu1 %v888_v33 }
 0x139   : > { %853 = vmatmul.f32.gmra.mxu2 %v781_v59  ;;  %829 = vmatmul.f32.gmra.mxu0 %v773_v61 }
 0x141   : > { %856 = vmatmul.f32.gmra.mxu2 %v782_v4  ;;  %832 = vmatmul.f32.gmra.mxu0 %v774_v5 }
 0x149   : > { %859 = vmatmul.f32.gmra.mxu2 %v783_v14  ;;  %835 = vmatmul.f32.gmra.mxu0 %v775_v17 }
 0x151   : > { %862 = vmatmul.f32.gmra.mxu2 %v784_v29  ;;  %838 = vmatmul.f32.gmra.mxu0 %v776_v30 }
 0x159   : > { %865 = vmatmul.f32.gmra.mxu2 %v785_v40  ;;  %841 = vmatmul.f32.gmra.mxu0 %v777_v43 }
 0x161   : > { %868 = vmatmul.f32.gmra.mxu2 %v786_v48  ;;  %844 = vmatmul.f32.gmra.mxu0 %v778_v27 }
 0x1a6   : > { %v824_v52 = vpop.f32.mrf.mxu0 }
 0x1a7   : > { %v825_v53 = vadd.f32 %v1291_v51, %v824_v52 }
 0x1a9   : > { %v872_v54 = vmax.f32 %v825_v53, 0.0 }
 0x1ab   : > { %924 = vmatmul.f32.vlgmr.msra.gmra.mxu1 %v872_v54 }
 0x1ac   : > { %v848_v55 = vpop.f32.mrf.mxu2 }
 0x1ad   : > { %v849_v56 = vadd.f32 %v1291_v51, %v848_v55 }
 0x1ae   : > { %v827_v57 = vpop.f32.mrf.mxu0 }
 0x1af   : > { %v880_v58 = vmax.f32 %v849_v56, 0.0  ;;  %v828_v59 = vadd.f32 %v1291_v51, %v827_v57 }
 0x1b1   : > { %948 = vmatmul.f32.vlgmr.msra.gmra.mxu3 %v880_v58  ;;  %v873_v60 = vmax.f32 %v828_v59, 0.0 }
 0x1b3   : > { %927 = vmatmul.f32.gmra.mxu1 %v873_v60 }
 0x1b4   : > { %v851_v61 = vpop.f32.mrf.mxu2 }
 0x1b5   : > { %v852_v62 = vadd.f32 %v1291_v51, %v851_v61 }
 0x1b6   : > { %v830_v63 = vpop.f32.mrf.mxu0 }
 0x1b7   : > { %v881_v0 = vmax.f32 %v852_v62, 0.0  ;;  %v831_v1 = vadd.f32 %v1291_v51, %v830_v63 }
 0x1b9   : > { %951 = vmatmul.f32.gmra.mxu3 %v881_v0  ;;  %v874_v2 = vmax.f32 %v831_v1, 0.0 }
 0x1bb   : > { %930 = vmatmul.f32.gmra.mxu1 %v874_v2 }
 0x1bc   : > { %v854_v3 = vpop.f32.mrf.mxu2 }
 0x1bd   : > { %v855_v4 = vadd.f32 %v1291_v51, %v854_v3 }
 0x1be   : > { %v833_v5 = vpop.f32.mrf.mxu0 }
 0x1bf   : > { %v882_v6 = vmax.f32 %v855_v4, 0.0  ;;  %v834_v7 = vadd.f32 %v1291_v51, %v833_v5 }
 0x1c1   : > { %954 = vmatmul.f32.gmra.mxu3 %v882_v6  ;;  %v875_v8 = vmax.f32 %v834_v7, 0.0 }
 0x1c3   : > { %933 = vmatmul.f32.gmra.mxu1 %v875_v8 }
 0x1c4   : > { %v857_v9 = vpop.f32.mrf.mxu2 }
 0x1c5   : > { %v858_v10 = vadd.f32 %v1291_v51, %v857_v9 }
 0x1c6   : > { %v836_v11 = vpop.f32.mrf.mxu0 }
 0x1c7   : > { %v883_v12 = vmax.f32 %v858_v10, 0.0  ;;  %v837_v13 = vadd.f32 %v1291_v51, %v836_v11 }
 0x1c9   : > { %957 = vmatmul.f32.gmra.mxu3 %v883_v12  ;;  %v876_v14 = vmax.f32 %v837_v13, 0.0 }
 0x1cb   : > { %936 = vmatmul.f32.gmra.mxu1 %v876_v14 }
 0x1cc   : > { %v860_v15 = vpop.f32.mrf.mxu2 }
 0x1cd   : > { %v861_v16 = vadd.f32 %v1291_v51, %v860_v15 }
 0x1ce   : > { %v839_v17 = vpop.f32.mrf.mxu0 }
 0x1cf   : > { %v884_v18 = vmax.f32 %v861_v16, 0.0  ;;  %v840_v19 = vadd.f32 %v1291_v51, %v839_v17 }
 0x1d1   : > { %960 = vmatmul.f32.gmra.mxu3 %v884_v18  ;;  %v877_v20 = vmax.f32 %v840_v19, 0.0 }
 0x1d3   : > { %939 = vmatmul.f32.gmra.mxu1 %v877_v20 }
 0x1d4   : > { %v863_v21 = vpop.f32.mrf.mxu2 }
 0x1d5   : > { %v864_v22 = vadd.f32 %v1291_v51, %v863_v21 }
 0x1d6   : > { %v842_v23 = vpop.f32.mrf.mxu0 }
 0x1d7   : > { %v885_v24 = vmax.f32 %v864_v22, 0.0  ;;  %v843_v25 = vadd.f32 %v1291_v51, %v842_v23 }
 0x1d9   : > { %963 = vmatmul.f32.gmra.mxu3 %v885_v24  ;;  %v878_v26 = vmax.f32 %v843_v25, 0.0 }
 0x1db   : > { %942 = vmatmul.f32.gmra.mxu1 %v878_v26 }
 0x1dc   : > { %v866_v28 = vpop.f32.mrf.mxu2 }
 0x1dd   : > { %v867_v29 = vadd.f32 %v1291_v51, %v866_v28 }
 0x1de   : > { %v845_v30 = vpop.f32.mrf.mxu0 }
 0x1df   : > { %v886_v31 = vmax.f32 %v867_v29, 0.0  ;;  %v846_v32 = vadd.f32 %v1291_v51, %v845_v30 }
 0x1e1   : > { %966 = vmatmul.f32.gmra.mxu3 %v886_v31  ;;  %v879_v34 = vmax.f32 %v846_v32, 0.0 }
 0x1e3   : > { %945 = vmatmul.f32.gmra.mxu1 %v879_v34 }
 0x1e4   : > { %v869_v35 = vpop.f32.mrf.mxu2 }
 0x1e5   : > { %v870_v36 = vadd.f32 %v1291_v51, %v869_v35 }
 0x1e7   : > { %v887_v37 = vmax.f32 %v870_v36, 0.0 }
 0x1e9   : > { %969 = vmatmul.f32.gmra.mxu3 %v887_v37 }
 0x228   : > { %v925_v39 = vpop.f32.mrf.mxu1 }
 0x229   : > { %v926_v40 = vadd.f32 %v1292_v38, %v925_v39 }
 0x22b   : > { %973 = vst [vmem:[%s1486_s14] sm:$0xff] %v926_v40 }
 0x230   : > { %v928_v41 = vpop.f32.mrf.mxu1 }
 0x231   : > { %v929_v42 = vadd.f32 %v1292_v38, %v928_v41 }
 0x233   : > { %974 = vst [vmem:[%s1486_s14 + $0x8] sm:$0xff] %v929_v42 }
 0x234   : > { %v949_v43 = vpop.f32.mrf.mxu3 }
 0x235   : > { %v950_v44 = vadd.f32 %v1292_v38, %v949_v43 }
 0x237   : > { %981 = vst [vmem:[%s1486_s14 + $0x40] sm:$0xff] %v950_v44 }
 0x238   : > { %v931_v45 = vpop.f32.mrf.mxu1 }
 0x239   : > { %v932_v46 = vadd.f32 %v1292_v38, %v931_v45 }
 0x23b   : > { %975 = vst [vmem:[%s1486_s14 + $0x10] sm:$0xff] %v932_v46 }
 0x23c   : > { %v952_v47 = vpop.f32.mrf.mxu3 }
 0x23d   : > { %v953_v48 = vadd.f32 %v1292_v38, %v952_v47 }
 0x23f   : > { %982 = vst [vmem:[%s1486_s14 + $0x48] sm:$0xff] %v953_v48 }
 0x240   : > { %v934_v27 = vpop.f32.mrf.mxu1 }
 0x241   : > { %v935_v49 = vadd.f32 %v1292_v38, %v934_v27 }
 0x243   : > { %976 = vst [vmem:[%s1486_s14 + $0x18] sm:$0xff] %v935_v49 }
 0x244   : > { %v955_v50 = vpop.f32.mrf.mxu3 }
 0x245   : > { %v956_v33 = vadd.f32 %v1292_v38, %v955_v50 }
 0x247   : > { %983 = vst [vmem:[%s1486_s14 + $0x50] sm:$0xff] %v956_v33 }
 0x248   : > { %v937_v51 = vpop.f32.mrf.mxu1 }
 0x249   : > { %v938_v52 = vadd.f32 %v1292_v38, %v937_v51 }
 0x24b   : > { %977 = vst [vmem:[%s1486_s14 + $0x20] sm:$0xff] %v938_v52 }
 0x24c   : > { %v958_v53 = vpop.f32.mrf.mxu3 }
 0x24d   : > { %v959_v54 = vadd.f32 %v1292_v38, %v958_v53 }
 0x24f   : > { %984 = vst [vmem:[%s1486_s14 + $0x58] sm:$0xff] %v959_v54 }
 0x250   : > { %v940_v55 = vpop.f32.mrf.mxu1 }
 0x251   : > { %v941_v56 = vadd.f32 %v1292_v38, %v940_v55 }
 0x253   : > { %978 = vst [vmem:[%s1486_s14 + $0x28] sm:$0xff] %v941_v56 }
 0x254   : > { %v961_v57 = vpop.f32.mrf.mxu3 }
 0x255   : > { %v962_v58 = vadd.f32 %v1292_v38, %v961_v57 }
 0x257   : > { %985 = vst [vmem:[%s1486_s14 + $0x60] sm:$0xff] %v962_v58 }
 0x258   : > { %v943_v59 = vpop.f32.mrf.mxu1 }
 0x259   : > { %v944_v60 = vadd.f32 %v1292_v38, %v943_v59 }
 0x25b   : > { %979 = vst [vmem:[%s1486_s14 + $0x30] sm:$0xff] %v944_v60 }
 0x25c   : > { %v964_v61 = vpop.f32.mrf.mxu3 }
 0x25d   : > { %v965_v62 = vadd.f32 %v1292_v38, %v964_v61 }
 0x25f   : > { %986 = vst [vmem:[%s1486_s14 + $0x68] sm:$0xff] %v965_v62 }
 0x260   : > { %v946_v63 = vpop.f32.mrf.mxu1 }
 0x261   : > { %v947_v0 = vadd.f32 %v1292_v38, %v946_v63 }
 0x263   : > { %980 = vst [vmem:[%s1486_s14 + $0x38] sm:$0xff] %v947_v0 }
 0x264   : > { %v967_v1 = vpop.f32.mrf.mxu3 }
 0x265   : > { %v968_v2 = vadd.f32 %v1292_v38, %v967_v1 }
 0x267   : > { %987 = vst [vmem:[%s1486_s14 + $0x70] sm:$0xff] %v968_v2 }
 0x26c   : > { %v970_v3 = vpop.f32.mrf.mxu3 }
 0x26d   : > { %v971_v4 = vadd.f32 %v1292_v38, %v970_v3 }
 0x26f   : > { %988 = vst [vmem:[%s1486_s14 + $0x78] sm:$0xff] %v971_v4 }
 0x270 PF: > { %s18_s11 = sadd.s32 1, %s1347_s11   ;;  %s1698_s27 = smov %s1327_s28 }
 0x271   : > { %p15_p0 = scmp.ge.s32.totalorder %s18_s11, 6   ;;  %s1699_s28 = smov %s1446_s18 }
 0x272   : > { %s1700_s29 = smov %s1339_s9  ;;  %s1701_s30 = smov %s1343_s10 }
 0x273   : > { %s1702_s9 = smov %s1705_s12  ;;  %s1703_s10 = smov %s1709_s13 }
 0x274   :  { %17 = sbr.rel (!%p15_p0) target bundleno = 4 (0x4), region = 139 }

</bundles_post_ra>
